<compile_context>
chip_gen: v6e
topology: v6e:2x2x1
jax: 0.10.0
libtpu: 0.0.40
codegen_flags: <defaults>
</compile_context>

<pallas_src>
import functools

import jax
import jax.numpy as jnp
from jax import lax
from jax.experimental import pallas as pl
from jax.experimental.pallas import tpu as pltpu

LANE = 128
SUB = 8
W_TARGET = 4096       # lane-block width target (fat DMA blocks)
TT_TARGET = 16        # time-block height target (multiple of 8)
CHUNK_ELEMS = 4096    # inner-chunk size: ~4 f32 vregs per live temporary
EPS = 1e-12
G_METRIC = 9.80665e-05  # parity with the module; gravity branch unused (default flag)

_TABLE_NAMES = ('PVTO', 'PVTW', 'PVDG', 'SWOF', 'SGOF')


def _augment_table(tbl):
    """Host side: [x, y1, y2, ...] -> rows of [x, y1, y2, slope1, slope2]."""
    tbl = jnp.asarray(tbl, jnp.float32)
    x, y1, y2 = tbl[:, 0], tbl[:, 1], tbl[:, 2]
    dx = x[1:] - x[:-1]
    zero = jnp.zeros((1,), jnp.float32)
    s1 = jnp.concatenate([(y1[1:] - y1[:-1]) / dx, zero])
    s2 = jnp.concatenate([(y2[1:] - y2[:-1]) / dx, zero])
    return jnp.stack([x, y1, y2, s1, s2], axis=1)


def _pack_tables(tables):
    """Concatenate all augmented tables into one flat 1-D f32 vector (SMEM friendly)."""
    offs, rows, flat, pos = {}, {}, [], 0
    for name in _TABLE_NAMES:
        aug = _augment_table(tables[name])
        offs[name] = pos
        rows[name] = int(aug.shape[0])
        flat.append(aug.reshape(-1))
        pos += int(aug.size)
    return jnp.concatenate(flat), offs, rows


def _interp2(tbl_ref, off, n_rows, x):
    """Clamped piecewise-linear interpolation of BOTH y-columns of one flat table.

    Flat row layout: [x, y1, y2, slope1, slope2].  The per-segment clip/subtract is
    shared between the two columns; slopes are SMEM scalars (no vector divides).
    """
    ya = jnp.full_like(x, tbl_ref[off + 1])
    yb = jnp.full_like(x, tbl_ref[off + 2])
    for i in range(n_rows - 1):
        row = off + 5 * i
        xi = tbl_ref[row]
        seg = jnp.clip(x, xi, tbl_ref[row + 5]) - xi   # shared between both columns
        ya = ya + seg * tbl_ref[row + 3]               # vector * scalar (VPU)
        yb = yb + seg * tbl_ref[row + 4]
    return ya, yb


def _rates_kernel(tbl_ref, pres_ref, swat_ref, sgas_ref, rs_ref,
                  bhpt_ref, perf_ref, cf_ref, out_ref,
                  *, offs, rows, chunk, nchunks):
    f32 = jnp.float32

    def compute(off):
        sl = pl.ds(off, chunk)
        p = pres_ref[:, sl].astype(f32)
        bh = bhpt_ref[:, sl].astype(f32)
        cfv = cf_ref[:, sl].astype(f32) * perf_ref[:, sl].astype(f32)
        # BHPT == 0 sentinel -> BHPT falls back to cell pressure (zero depression).
        # perf == 0 masking is already folded into cfv = cf * perf (so base == 0 there).
        base = (p - jnp.where(bh == 0.0, p, bh)) * cfv

        # --- BWPR: PVTW (FVF, mu) @ pressure, SWOF krw @ SWAT ---
        sw = swat_ref[:, sl].astype(f32)
        krw, krow = _interp2(tbl_ref, offs['SWOF'], rows['SWOF'], sw)  # krow reused for kro
        fvf_w, mu_w = _interp2(tbl_ref, offs['PVTW'], rows['PVTW'], p)
        out_ref[1, :, sl] = jnp.maximum(
            base * krw * pl.reciprocal(jnp.maximum(mu_w * fvf_w, EPS), approx=True), 0.0)

        # --- BOPR: PVTO (FVF, mu) @ pressure, Baker kro(SWAT, SGAS) ---
        # TODO(synk): PVTO is really a 2-D (RS, PRESSURE) table; treated as 1-D in pressure.
        # TODO(synk): Baker linear model approximated by the saturation-weighted blend.
        sg = sgas_ref[:, sl].astype(f32)
        krg, krog = _interp2(tbl_ref, offs['SGOF'], rows['SGOF'], sg)  # krg reused for gas
        swc = tbl_ref[offs['SWOF']]                    # connate water saturation
        swn = sw - swc
        den = sg + swn
        kro = jnp.where(den > 1e-6,
                        (sg * krog + swn * krow)
                        * pl.reciprocal(jnp.maximum(den, 1e-6), approx=True),
                        0.5 * (krow + krog))
        fvf_o, mu_o = _interp2(tbl_ref, offs['PVTO'], rows['PVTO'], p)
        rate_o = base * kro * pl.reciprocal(jnp.maximum(mu_o * fvf_o, EPS), approx=True)
        out_ref[0, :, sl] = jnp.maximum(rate_o, 0.0)

        # --- BGPR: PVDG (FVF, mu) @ pressure, SGOF krg @ SGAS, plus RS * (pre-clip) BOPR;
        #     clipped only at the very end, exactly like the torch module. ---
        fvf_g, mu_g = _interp2(tbl_ref, offs['PVDG'], rows['PVDG'], p)
        rate_g = (base * krg
                  * pl.reciprocal(jnp.maximum(mu_g * fvf_g, EPS), approx=True)
                  + rs_ref[:, sl].astype(f32) * rate_o)
        out_ref[2, :, sl] = jnp.maximum(rate_g, 0.0)

    if nchunks == 1:
        compute(0)
    else:
        def body(ci, carry):
            compute(pl.multiple_of(ci * chunk, chunk))
            return carry
        lax.fori_loop(0, nchunks, body, 0)


@functools.partial(jax.jit, static_argnames=("input_dtype",))
def rates_forward(states, control, perf_mask, cf_mask, tables,
                  input_dtype=jnp.float32):
    """Pallas implementation of RatesModule.forward with default flags.

    states:    [n_ts, 5, N]    channels = (PRESSURE, SOIL, SWAT, SGAS, RS)
    control:   [n_ts-1, 1, N]  channels = (BHPT,)
    perf_mask: [n_ts-1, N]
    cf_mask:   [n_ts-1, N]
    returns:   [n_ts-1, 3, N]  rates ordered (BOPR, BWPR, BGPR)

    input_dtype=jnp.bfloat16 halves field HBM traffic (recommended on v5e); in-kernel
    arithmetic stays f32 on every generation.
    """
    # TODO(synk): FieldSample plumbing (at_wells, Denormalize, batch-dim transforms) and
    #             use_gravitational_adjustment are not represented here (defaults used).
    states = jnp.asarray(states)
    control = jnp.asarray(control)
    t, n = perf_mask.shape

    st = states[1:]                                    # matches sample['STATES'][1:]
    # 7 separate field inputs (cheap narrow slices) -- no stacked/padded slab HBM pass.
    prep = lambda x: jnp.asarray(x, input_dtype)
    fields = (prep(st[:, 0]), prep(st[:, 2]), prep(st[:, 3]), prep(st[:, 4]),
              prep(control[:, 0]), prep(perf_mask), prep(cf_mask))

    # --- tiling: fat (8,128)-legal blocks, no host-side padding (edge blocks masked) ---
    tt = t if t < SUB else min(TT_TARGET, (t // SUB) * SUB)
    if n < LANE:
        w = n
    else:
        n_floor = (n // LANE) * LANE
        w = min(W_TARGET, n_floor)
        # keep >= 2 still-fat lane blocks so both v7x TensorCores can get work
        if pl.cdiv(n, w) < 2 and n_floor >= 2 * 512:
            w = (n_floor // 2) // LANE * LANE
    # inner lane chunk: bounds the live vreg set (~40 regs) while the DMA block stays fat
    if w % LANE != 0:
        chunk = w
    else:
        chunk = max(LANE, min(w, (CHUNK_ELEMS // max(tt, 1)) // LANE * LANE))
        while w % chunk != 0:
            chunk -= LANE
    nchunks = w // chunk

    tbl_flat, offs, rows = _pack_tables(tables)

    kernel = functools.partial(_rates_kernel, offs=offs, rows=rows,
                               chunk=chunk, nchunks=nchunks)

    field_spec = pl.BlockSpec((tt, w), lambda ti, j: (ti, j))
    out = pl.pallas_call(
        kernel,
        out_shape=jax.ShapeDtypeStruct((3, t, n), jnp.float32),   # channel-dense layout
        grid=(pl.cdiv(t, tt), pl.cdiv(n, w)),
        in_specs=[pl.BlockSpec(memory_space=pltpu.MemorySpace.SMEM)] + [field_spec] * 7,
        out_specs=pl.BlockSpec((3, tt, w), lambda ti, j: (0, ti, j)),
        compiler_params=pltpu.CompilerParams(
            # TODO(synk): on v7x consider pltpu.CORE_PARALLEL / core_map on the lane axis
            #             to guarantee 2-TensorCore sharding.
            dimension_semantics=("parallel", "parallel")),
    )(tbl_flat, *fields)

    # one XLA transpose to the consumer layout [n_ts-1, 3(BOPR,BWPR,BGPR), N]
    return jnp.transpose(out, (1, 0, 2))


if __name__ == "__main__":
    key = jax.random.PRNGKey(0)
    # Non-round sizes on purpose: exercises edge-masked partial blocks (t=9 vs tt=8,
    # n=1000 vs 128-multiple lane blocks) and the inner chunked fori_loop path.
    n_ts, n = 10, 1000
    t = n_ts - 1
    ks = jax.random.split(key, 8)

    pressure = 200.0 + 150.0 * jax.random.uniform(ks[0], (n_ts, n))
    soil = jax.random.uniform(ks[1], (n_ts, n))
    swat = 0.2 + 0.6 * jax.random.uniform(ks[2], (n_ts, n))
    sgas = jnp.clip(1.0 - soil - swat, 0.0, 1.0)
    rs = 50.0 + 50.0 * jax.random.uniform(ks[3], (n_ts, n))
    states = jnp.stack([pressure, soil, swat, sgas, rs], axis=1)        # [n_ts, 5, N]

    bhp = pressure[1:] - 20.0 - 30.0 * jax.random.uniform(ks[4], (t, n))
    bhp_on = jax.random.bernoulli(ks[5], 0.8, (t, n)).astype(jnp.float32)
    control = (bhp * bhp_on)[:, None, :]            # [T, 1, N]; zeros -> fall back to pressure

    perf_mask = jax.random.bernoulli(ks[6], 0.7, (t, n)).astype(jnp.float32)
    cf_mask = 0.5 + jax.random.uniform(ks[7], (t, n))

    tables = {
        'PVTO': jnp.stack([jnp.linspace(1.0, 450.0, 8),
                           jnp.linspace(1.05, 1.40, 8),
                           jnp.linspace(1.30, 0.60, 8)], axis=1),
        'PVTW': jnp.stack([jnp.linspace(1.0, 450.0, 4),
                           jnp.linspace(1.02, 0.98, 4),
                           jnp.linspace(0.50, 0.45, 4)], axis=1),
        'PVDG': jnp.stack([jnp.linspace(1.0, 450.0, 6),
                           jnp.linspace(0.20, 0.004, 6),
                           jnp.linspace(0.012, 0.030, 6)], axis=1),
        'SWOF': jnp.stack([jnp.linspace(0.2, 1.0, 6),
                           jnp.linspace(0.0, 1.0, 6) ** 2,
                           jnp.linspace(1.0, 0.0, 6) ** 2,
                           jnp.zeros(6)], axis=1),
        'SGOF': jnp.stack([jnp.linspace(0.0, 0.8, 6),
                           jnp.linspace(0.0, 0.9, 6) ** 2,
                           jnp.linspace(1.0, 0.0, 6) ** 2,
                           jnp.zeros(6)], axis=1),
        'DENSITY': jnp.array([[800.0, 1000.0, 1.0]]),  # only needed for the gravity branch
    }

    rates = rates_forward(states, control, perf_mask, cf_mask, tables)
    rates = jax.block_until_ready(rates)
    assert rates.shape == (t, 3, n)
    assert bool(jnp.all(jnp.isfinite(rates)))
    assert bool(jnp.all(rates >= 0.0))
    print("KERNEL_OK")
</pallas_src>

<mosaic_0001>
module attributes {stable_mosaic.version = 11 : i64} {
  func.func @_rates_kernel(%arg0: i32, %arg1: i32, %arg2: memref<150xf32, #tpu.memory_space<smem>>, %arg3: memref<8x896xf32, #tpu.memory_space<vmem>>, %arg4: memref<8x896xf32, #tpu.memory_space<vmem>>, %arg5: memref<8x896xf32, #tpu.memory_space<vmem>>, %arg6: memref<8x896xf32, #tpu.memory_space<vmem>>, %arg7: memref<8x896xf32, #tpu.memory_space<vmem>>, %arg8: memref<8x896xf32, #tpu.memory_space<vmem>>, %arg9: memref<8x896xf32, #tpu.memory_space<vmem>>, %arg10: memref<3x8x896xf32, #tpu.memory_space<vmem>>) attributes {dimension_semantics = [#tpu.dimension_semantics<parallel>, #tpu.dimension_semantics<parallel>], iteration_bounds = array<i64: 2, 2>, scalar_prefetch = 0 : i64, scratch_operands = 0 : i64, tpu.core_type = #tpu.core_type<tc>, window_params = [{transform_indices = @transform_0, window_bounds = array<i64: 150>}, {transform_indices = @transform_1, window_bounds = array<i64: 8, 896>}, {transform_indices = @transform_2, window_bounds = array<i64: 8, 896>}, {transform_indices = @transform_3, window_bounds = array<i64: 8, 896>}, {transform_indices = @transform_4, window_bounds = array<i64: 8, 896>}, {transform_indices = @transform_5, window_bounds = array<i64: 8, 896>}, {transform_indices = @transform_6, window_bounds = array<i64: 8, 896>}, {transform_indices = @transform_7, window_bounds = array<i64: 8, 896>}, {transform_indices = @transform_8, window_bounds = array<i64: 3, 8, 896>}]} {
    %c0_i32 = arith.constant 0 : i32
    %c7_i32 = arith.constant 7 : i32
    %0 = arith.addi %c0_i32, %c7_i32 : i32
    %c1_i32 = arith.constant 1 : i32
    scf.for %arg11 = %c0_i32 to %0 step %c1_i32  : i32 {
      %c128_i32 = arith.constant 128 : i32
      %1 = arith.muli %arg11, %c128_i32 : i32
      %2 = tpu.assume_multiple %1, 128 : i32
      %c0 = arith.constant 0 : index
      %3 = arith.index_cast %2 : i32 to index
      %4 = vector.load %arg3[%c0, %3] : memref<8x896xf32, #tpu.memory_space<vmem>>, vector<8x128xf32>
      %c0_1 = arith.constant 0 : index
      %5 = arith.index_cast %2 : i32 to index
      %6 = vector.load %arg7[%c0_1, %5] : memref<8x896xf32, #tpu.memory_space<vmem>>, vector<8x128xf32>
      %c0_2 = arith.constant 0 : index
      %7 = arith.index_cast %2 : i32 to index
      %8 = vector.load %arg9[%c0_2, %7] : memref<8x896xf32, #tpu.memory_space<vmem>>, vector<8x128xf32>
      %c0_3 = arith.constant 0 : index
      %9 = arith.index_cast %2 : i32 to index
      %10 = vector.load %arg8[%c0_3, %9] : memref<8x896xf32, #tpu.memory_space<vmem>>, vector<8x128xf32>
      %11 = arith.mulf %8, %10 : vector<8x128xf32>
      %cst = arith.constant 0.000000e+00 : f32
      %12 = vector.broadcast %cst : f32 to vector<8x128xf32>
      %13 = arith.cmpf oeq, %6, %12 : vector<8x128xf32>
      %14 = arith.select %13, %4, %6 : vector<8x128xi1>, vector<8x128xf32>
      %15 = arith.subf %4, %14 : vector<8x128xf32>
      %16 = arith.mulf %15, %11 : vector<8x128xf32>
      %c0_4 = arith.constant 0 : index
      %17 = arith.index_cast %2 : i32 to index
      %18 = vector.load %arg4[%c0_4, %17] : memref<8x896xf32, #tpu.memory_space<vmem>>, vector<8x128xf32>
      %c91 = arith.constant 91 : index
      %19 = memref.load %arg2[%c91] : memref<150xf32, #tpu.memory_space<smem>>
      %20 = vector.broadcast %19 : f32 to vector<8x128xf32>
      %c92 = arith.constant 92 : index
      %21 = memref.load %arg2[%c92] : memref<150xf32, #tpu.memory_space<smem>>
      %22 = vector.broadcast %21 : f32 to vector<8x128xf32>
      %c90 = arith.constant 90 : index
      %23 = memref.load %arg2[%c90] : memref<150xf32, #tpu.memory_space<smem>>
      %c95 = arith.constant 95 : index
      %24 = memref.load %arg2[%c95] : memref<150xf32, #tpu.memory_space<smem>>
      %25 = vector.broadcast %23 : f32 to vector<8x128xf32>
      %26 = arith.maximumf %25, %18 : vector<8x128xf32>
      %27 = vector.broadcast %24 : f32 to vector<8x128xf32>
      %28 = arith.minimumf %27, %26 : vector<8x128xf32>
      %29 = vector.broadcast %23 : f32 to vector<8x128xf32>
      %30 = arith.subf %28, %29 : vector<8x128xf32>
      %c93 = arith.constant 93 : index
      %31 = memref.load %arg2[%c93] : memref<150xf32, #tpu.memory_space<smem>>
      %32 = vector.broadcast %31 : f32 to vector<8x128xf32>
      %33 = arith.mulf %30, %32 : vector<8x128xf32>
      %34 = arith.addf %20, %33 : vector<8x128xf32>
      %c94 = arith.constant 94 : index
      %35 = memref.load %arg2[%c94] : memref<150xf32, #tpu.memory_space<smem>>
      %36 = vector.broadcast %35 : f32 to vector<8x128xf32>
      %37 = arith.mulf %30, %36 : vector<8x128xf32>
      %38 = arith.addf %22, %37 : vector<8x128xf32>
      %c95_5 = arith.constant 95 : index
      %39 = memref.load %arg2[%c95_5] : memref<150xf32, #tpu.memory_space<smem>>
      %c100 = arith.constant 100 : index
      %40 = memref.load %arg2[%c100] : memref<150xf32, #tpu.memory_space<smem>>
      %41 = vector.broadcast %39 : f32 to vector<8x128xf32>
      %42 = arith.maximumf %41, %18 : vector<8x128xf32>
      %43 = vector.broadcast %40 : f32 to vector<8x128xf32>
      %44 = arith.minimumf %43, %42 : vector<8x128xf32>
      %45 = vector.broadcast %39 : f32 to vector<8x128xf32>
      %46 = arith.subf %44, %45 : vector<8x128xf32>
      %c98 = arith.constant 98 : index
      %47 = memref.load %arg2[%c98] : memref<150xf32, #tpu.memory_space<smem>>
      %48 = vector.broadcast %47 : f32 to vector<8x128xf32>
      %49 = arith.mulf %46, %48 : vector<8x128xf32>
      %50 = arith.addf %34, %49 : vector<8x128xf32>
      %c99 = arith.constant 99 : index
      %51 = memref.load %arg2[%c99] : memref<150xf32, #tpu.memory_space<smem>>
      %52 = vector.broadcast %51 : f32 to vector<8x128xf32>
      %53 = arith.mulf %46, %52 : vector<8x128xf32>
      %54 = arith.addf %38, %53 : vector<8x128xf32>
      %c100_6 = arith.constant 100 : index
      %55 = memref.load %arg2[%c100_6] : memref<150xf32, #tpu.memory_space<smem>>
      %c105 = arith.constant 105 : index
      %56 = memref.load %arg2[%c105] : memref<150xf32, #tpu.memory_space<smem>>
      %57 = vector.broadcast %55 : f32 to vector<8x128xf32>
      %58 = arith.maximumf %57, %18 : vector<8x128xf32>
      %59 = vector.broadcast %56 : f32 to vector<8x128xf32>
      %60 = arith.minimumf %59, %58 : vector<8x128xf32>
      %61 = vector.broadcast %55 : f32 to vector<8x128xf32>
      %62 = arith.subf %60, %61 : vector<8x128xf32>
      %c103 = arith.constant 103 : index
      %63 = memref.load %arg2[%c103] : memref<150xf32, #tpu.memory_space<smem>>
      %64 = vector.broadcast %63 : f32 to vector<8x128xf32>
      %65 = arith.mulf %62, %64 : vector<8x128xf32>
      %66 = arith.addf %50, %65 : vector<8x128xf32>
      %c104 = arith.constant 104 : index
      %67 = memref.load %arg2[%c104] : memref<150xf32, #tpu.memory_space<smem>>
      %68 = vector.broadcast %67 : f32 to vector<8x128xf32>
      %69 = arith.mulf %62, %68 : vector<8x128xf32>
      %70 = arith.addf %54, %69 : vector<8x128xf32>
      %c105_7 = arith.constant 105 : index
      %71 = memref.load %arg2[%c105_7] : memref<150xf32, #tpu.memory_space<smem>>
      %c110 = arith.constant 110 : index
      %72 = memref.load %arg2[%c110] : memref<150xf32, #tpu.memory_space<smem>>
      %73 = vector.broadcast %71 : f32 to vector<8x128xf32>
      %74 = arith.maximumf %73, %18 : vector<8x128xf32>
      %75 = vector.broadcast %72 : f32 to vector<8x128xf32>
      %76 = arith.minimumf %75, %74 : vector<8x128xf32>
      %77 = vector.broadcast %71 : f32 to vector<8x128xf32>
      %78 = arith.subf %76, %77 : vector<8x128xf32>
      %c108 = arith.constant 108 : index
      %79 = memref.load %arg2[%c108] : memref<150xf32, #tpu.memory_space<smem>>
      %80 = vector.broadcast %79 : f32 to vector<8x128xf32>
      %81 = arith.mulf %78, %80 : vector<8x128xf32>
      %82 = arith.addf %66, %81 : vector<8x128xf32>
      %c109 = arith.constant 109 : index
      %83 = memref.load %arg2[%c109] : memref<150xf32, #tpu.memory_space<smem>>
      %84 = vector.broadcast %83 : f32 to vector<8x128xf32>
      %85 = arith.mulf %78, %84 : vector<8x128xf32>
      %86 = arith.addf %70, %85 : vector<8x128xf32>
      %c110_8 = arith.constant 110 : index
      %87 = memref.load %arg2[%c110_8] : memref<150xf32, #tpu.memory_space<smem>>
      %c115 = arith.constant 115 : index
      %88 = memref.load %arg2[%c115] : memref<150xf32, #tpu.memory_space<smem>>
      %89 = vector.broadcast %87 : f32 to vector<8x128xf32>
      %90 = arith.maximumf %89, %18 : vector<8x128xf32>
      %91 = vector.broadcast %88 : f32 to vector<8x128xf32>
      %92 = arith.minimumf %91, %90 : vector<8x128xf32>
      %93 = vector.broadcast %87 : f32 to vector<8x128xf32>
      %94 = arith.subf %92, %93 : vector<8x128xf32>
      %c113 = arith.constant 113 : index
      %95 = memref.load %arg2[%c113] : memref<150xf32, #tpu.memory_space<smem>>
      %96 = vector.broadcast %95 : f32 to vector<8x128xf32>
      %97 = arith.mulf %94, %96 : vector<8x128xf32>
      %98 = arith.addf %82, %97 : vector<8x128xf32>
      %c114 = arith.constant 114 : index
      %99 = memref.load %arg2[%c114] : memref<150xf32, #tpu.memory_space<smem>>
      %100 = vector.broadcast %99 : f32 to vector<8x128xf32>
      %101 = arith.mulf %94, %100 : vector<8x128xf32>
      %102 = arith.addf %86, %101 : vector<8x128xf32>
      %c41 = arith.constant 41 : index
      %103 = memref.load %arg2[%c41] : memref<150xf32, #tpu.memory_space<smem>>
      %104 = vector.broadcast %103 : f32 to vector<8x128xf32>
      %c42 = arith.constant 42 : index
      %105 = memref.load %arg2[%c42] : memref<150xf32, #tpu.memory_space<smem>>
      %106 = vector.broadcast %105 : f32 to vector<8x128xf32>
      %c40 = arith.constant 40 : index
      %107 = memref.load %arg2[%c40] : memref<150xf32, #tpu.memory_space<smem>>
      %c45 = arith.constant 45 : index
      %108 = memref.load %arg2[%c45] : memref<150xf32, #tpu.memory_space<smem>>
      %109 = vector.broadcast %107 : f32 to vector<8x128xf32>
      %110 = arith.maximumf %109, %4 : vector<8x128xf32>
      %111 = vector.broadcast %108 : f32 to vector<8x128xf32>
      %112 = arith.minimumf %111, %110 : vector<8x128xf32>
      %113 = vector.broadcast %107 : f32 to vector<8x128xf32>
      %114 = arith.subf %112, %113 : vector<8x128xf32>
      %c43 = arith.constant 43 : index
      %115 = memref.load %arg2[%c43] : memref<150xf32, #tpu.memory_space<smem>>
      %116 = vector.broadcast %115 : f32 to vector<8x128xf32>
      %117 = arith.mulf %114, %116 : vector<8x128xf32>
      %118 = arith.addf %104, %117 : vector<8x128xf32>
      %c44 = arith.constant 44 : index
      %119 = memref.load %arg2[%c44] : memref<150xf32, #tpu.memory_space<smem>>
      %120 = vector.broadcast %119 : f32 to vector<8x128xf32>
      %121 = arith.mulf %114, %120 : vector<8x128xf32>
      %122 = arith.addf %106, %121 : vector<8x128xf32>
      %c45_9 = arith.constant 45 : index
      %123 = memref.load %arg2[%c45_9] : memref<150xf32, #tpu.memory_space<smem>>
      %c50 = arith.constant 50 : index
      %124 = memref.load %arg2[%c50] : memref<150xf32, #tpu.memory_space<smem>>
      %125 = vector.broadcast %123 : f32 to vector<8x128xf32>
      %126 = arith.maximumf %125, %4 : vector<8x128xf32>
      %127 = vector.broadcast %124 : f32 to vector<8x128xf32>
      %128 = arith.minimumf %127, %126 : vector<8x128xf32>
      %129 = vector.broadcast %123 : f32 to vector<8x128xf32>
      %130 = arith.subf %128, %129 : vector<8x128xf32>
      %c48 = arith.constant 48 : index
      %131 = memref.load %arg2[%c48] : memref<150xf32, #tpu.memory_space<smem>>
      %132 = vector.broadcast %131 : f32 to vector<8x128xf32>
      %133 = arith.mulf %130, %132 : vector<8x128xf32>
      %134 = arith.addf %118, %133 : vector<8x128xf32>
      %c49 = arith.constant 49 : index
      %135 = memref.load %arg2[%c49] : memref<150xf32, #tpu.memory_space<smem>>
      %136 = vector.broadcast %135 : f32 to vector<8x128xf32>
      %137 = arith.mulf %130, %136 : vector<8x128xf32>
      %138 = arith.addf %122, %137 : vector<8x128xf32>
      %c50_10 = arith.constant 50 : index
      %139 = memref.load %arg2[%c50_10] : memref<150xf32, #tpu.memory_space<smem>>
      %c55 = arith.constant 55 : index
      %140 = memref.load %arg2[%c55] : memref<150xf32, #tpu.memory_space<smem>>
      %141 = vector.broadcast %139 : f32 to vector<8x128xf32>
      %142 = arith.maximumf %141, %4 : vector<8x128xf32>
      %143 = vector.broadcast %140 : f32 to vector<8x128xf32>
      %144 = arith.minimumf %143, %142 : vector<8x128xf32>
      %145 = vector.broadcast %139 : f32 to vector<8x128xf32>
      %146 = arith.subf %144, %145 : vector<8x128xf32>
      %c53 = arith.constant 53 : index
      %147 = memref.load %arg2[%c53] : memref<150xf32, #tpu.memory_space<smem>>
      %148 = vector.broadcast %147 : f32 to vector<8x128xf32>
      %149 = arith.mulf %146, %148 : vector<8x128xf32>
      %150 = arith.addf %134, %149 : vector<8x128xf32>
      %c54 = arith.constant 54 : index
      %151 = memref.load %arg2[%c54] : memref<150xf32, #tpu.memory_space<smem>>
      %152 = vector.broadcast %151 : f32 to vector<8x128xf32>
      %153 = arith.mulf %146, %152 : vector<8x128xf32>
      %154 = arith.addf %138, %153 : vector<8x128xf32>
      %155 = arith.mulf %16, %98 : vector<8x128xf32>
      %156 = arith.mulf %154, %150 : vector<8x128xf32>
      %cst_11 = arith.constant 9.99999996E-13 : f32
      %157 = vector.broadcast %cst_11 : f32 to vector<8x128xf32>
      %158 = arith.maximumf %156, %157 : vector<8x128xf32>
      %159 = tpu.reciprocal %158 {approx = true} : vector<8x128xf32> -> vector<8x128xf32>
      %160 = arith.mulf %155, %159 : vector<8x128xf32>
      %cst_12 = arith.constant 0.000000e+00 : f32
      %161 = vector.broadcast %cst_12 : f32 to vector<8x128xf32>
      %162 = arith.maximumf %160, %161 : vector<8x128xf32>
      %c1 = arith.constant 1 : index
      %c0_13 = arith.constant 0 : index
      %163 = arith.index_cast %2 : i32 to index
      %164 = vector.load %arg10[%c1, %c0_13, %163] : memref<3x8x896xf32, #tpu.memory_space<vmem>>, vector<1x8x128xf32>
      %165 = vector.shape_cast %164 : vector<1x8x128xf32> to vector<8x128xf32>
      %166 = vector.shape_cast %162 : vector<8x128xf32> to vector<1x8x128xf32>
      tpu.vector_store %arg10[%c1, %c0_13, %163], %166 {strides = array<i32>} : memref<3x8x896xf32, #tpu.memory_space<vmem>>, vector<1x8x128xf32>,
      %c0_14 = arith.constant 0 : index
      %167 = arith.index_cast %2 : i32 to index
      %168 = vector.load %arg5[%c0_14, %167] : memref<8x896xf32, #tpu.memory_space<vmem>>, vector<8x128xf32>
      %c121 = arith.constant 121 : index
      %169 = memref.load %arg2[%c121] : memref<150xf32, #tpu.memory_space<smem>>
      %170 = vector.broadcast %169 : f32 to vector<8x128xf32>
      %c122 = arith.constant 122 : index
      %171 = memref.load %arg2[%c122] : memref<150xf32, #tpu.memory_space<smem>>
      %172 = vector.broadcast %171 : f32 to vector<8x128xf32>
      %c120 = arith.constant 120 : index
      %173 = memref.load %arg2[%c120] : memref<150xf32, #tpu.memory_space<smem>>
      %c125 = arith.constant 125 : index
      %174 = memref.load %arg2[%c125] : memref<150xf32, #tpu.memory_space<smem>>
      %175 = vector.broadcast %173 : f32 to vector<8x128xf32>
      %176 = arith.maximumf %175, %168 : vector<8x128xf32>
      %177 = vector.broadcast %174 : f32 to vector<8x128xf32>
      %178 = arith.minimumf %177, %176 : vector<8x128xf32>
      %179 = vector.broadcast %173 : f32 to vector<8x128xf32>
      %180 = arith.subf %178, %179 : vector<8x128xf32>
      %c123 = arith.constant 123 : index
      %181 = memref.load %arg2[%c123] : memref<150xf32, #tpu.memory_space<smem>>
      %182 = vector.broadcast %181 : f32 to vector<8x128xf32>
      %183 = arith.mulf %180, %182 : vector<8x128xf32>
      %184 = arith.addf %170, %183 : vector<8x128xf32>
      %c124 = arith.constant 124 : index
      %185 = memref.load %arg2[%c124] : memref<150xf32, #tpu.memory_space<smem>>
      %186 = vector.broadcast %185 : f32 to vector<8x128xf32>
      %187 = arith.mulf %180, %186 : vector<8x128xf32>
      %188 = arith.addf %172, %187 : vector<8x128xf32>
      %c125_15 = arith.constant 125 : index
      %189 = memref.load %arg2[%c125_15] : memref<150xf32, #tpu.memory_space<smem>>
      %c130 = arith.constant 130 : index
      %190 = memref.load %arg2[%c130] : memref<150xf32, #tpu.memory_space<smem>>
      %191 = vector.broadcast %189 : f32 to vector<8x128xf32>
      %192 = arith.maximumf %191, %168 : vector<8x128xf32>
      %193 = vector.broadcast %190 : f32 to vector<8x128xf32>
      %194 = arith.minimumf %193, %192 : vector<8x128xf32>
      %195 = vector.broadcast %189 : f32 to vector<8x128xf32>
      %196 = arith.subf %194, %195 : vector<8x128xf32>
      %c128 = arith.constant 128 : index
      %197 = memref.load %arg2[%c128] : memref<150xf32, #tpu.memory_space<smem>>
      %198 = vector.broadcast %197 : f32 to vector<8x128xf32>
      %199 = arith.mulf %196, %198 : vector<8x128xf32>
      %200 = arith.addf %184, %199 : vector<8x128xf32>
      %c129 = arith.constant 129 : index
      %201 = memref.load %arg2[%c129] : memref<150xf32, #tpu.memory_space<smem>>
      %202 = vector.broadcast %201 : f32 to vector<8x128xf32>
      %203 = arith.mulf %196, %202 : vector<8x128xf32>
      %204 = arith.addf %188, %203 : vector<8x128xf32>
      %c130_16 = arith.constant 130 : index
      %205 = memref.load %arg2[%c130_16] : memref<150xf32, #tpu.memory_space<smem>>
      %c135 = arith.constant 135 : index
      %206 = memref.load %arg2[%c135] : memref<150xf32, #tpu.memory_space<smem>>
      %207 = vector.broadcast %205 : f32 to vector<8x128xf32>
      %208 = arith.maximumf %207, %168 : vector<8x128xf32>
      %209 = vector.broadcast %206 : f32 to vector<8x128xf32>
      %210 = arith.minimumf %209, %208 : vector<8x128xf32>
      %211 = vector.broadcast %205 : f32 to vector<8x128xf32>
      %212 = arith.subf %210, %211 : vector<8x128xf32>
      %c133 = arith.constant 133 : index
      %213 = memref.load %arg2[%c133] : memref<150xf32, #tpu.memory_space<smem>>
      %214 = vector.broadcast %213 : f32 to vector<8x128xf32>
      %215 = arith.mulf %212, %214 : vector<8x128xf32>
      %216 = arith.addf %200, %215 : vector<8x128xf32>
      %c134 = arith.constant 134 : index
      %217 = memref.load %arg2[%c134] : memref<150xf32, #tpu.memory_space<smem>>
      %218 = vector.broadcast %217 : f32 to vector<8x128xf32>
      %219 = arith.mulf %212, %218 : vector<8x128xf32>
      %220 = arith.addf %204, %219 : vector<8x128xf32>
      %c135_17 = arith.constant 135 : index
      %221 = memref.load %arg2[%c135_17] : memref<150xf32, #tpu.memory_space<smem>>
      %c140 = arith.constant 140 : index
      %222 = memref.load %arg2[%c140] : memref<150xf32, #tpu.memory_space<smem>>
      %223 = vector.broadcast %221 : f32 to vector<8x128xf32>
      %224 = arith.maximumf %223, %168 : vector<8x128xf32>
      %225 = vector.broadcast %222 : f32 to vector<8x128xf32>
      %226 = arith.minimumf %225, %224 : vector<8x128xf32>
      %227 = vector.broadcast %221 : f32 to vector<8x128xf32>
      %228 = arith.subf %226, %227 : vector<8x128xf32>
      %c138 = arith.constant 138 : index
      %229 = memref.load %arg2[%c138] : memref<150xf32, #tpu.memory_space<smem>>
      %230 = vector.broadcast %229 : f32 to vector<8x128xf32>
      %231 = arith.mulf %228, %230 : vector<8x128xf32>
      %232 = arith.addf %216, %231 : vector<8x128xf32>
      %c139 = arith.constant 139 : index
      %233 = memref.load %arg2[%c139] : memref<150xf32, #tpu.memory_space<smem>>
      %234 = vector.broadcast %233 : f32 to vector<8x128xf32>
      %235 = arith.mulf %228, %234 : vector<8x128xf32>
      %236 = arith.addf %220, %235 : vector<8x128xf32>
      %c140_18 = arith.constant 140 : index
      %237 = memref.load %arg2[%c140_18] : memref<150xf32, #tpu.memory_space<smem>>
      %c145 = arith.constant 145 : index
      %238 = memref.load %arg2[%c145] : memref<150xf32, #tpu.memory_space<smem>>
      %239 = vector.broadcast %237 : f32 to vector<8x128xf32>
      %240 = arith.maximumf %239, %168 : vector<8x128xf32>
      %241 = vector.broadcast %238 : f32 to vector<8x128xf32>
      %242 = arith.minimumf %241, %240 : vector<8x128xf32>
      %243 = vector.broadcast %237 : f32 to vector<8x128xf32>
      %244 = arith.subf %242, %243 : vector<8x128xf32>
      %c143 = arith.constant 143 : index
      %245 = memref.load %arg2[%c143] : memref<150xf32, #tpu.memory_space<smem>>
      %246 = vector.broadcast %245 : f32 to vector<8x128xf32>
      %247 = arith.mulf %244, %246 : vector<8x128xf32>
      %248 = arith.addf %232, %247 : vector<8x128xf32>
      %c144 = arith.constant 144 : index
      %249 = memref.load %arg2[%c144] : memref<150xf32, #tpu.memory_space<smem>>
      %250 = vector.broadcast %249 : f32 to vector<8x128xf32>
      %251 = arith.mulf %244, %250 : vector<8x128xf32>
      %252 = arith.addf %236, %251 : vector<8x128xf32>
      %c90_19 = arith.constant 90 : index
      %253 = memref.load %arg2[%c90_19] : memref<150xf32, #tpu.memory_space<smem>>
      %254 = vector.broadcast %253 : f32 to vector<8x128xf32>
      %255 = arith.subf %18, %254 : vector<8x128xf32>
      %256 = arith.addf %168, %255 : vector<8x128xf32>
      %cst_20 = arith.constant 9.99999997E-7 : f32
      %257 = vector.broadcast %cst_20 : f32 to vector<8x128xf32>
      %258 = arith.cmpf ogt, %256, %257 : vector<8x128xf32>
      %259 = arith.mulf %168, %252 : vector<8x128xf32>
      %260 = arith.mulf %255, %102 : vector<8x128xf32>
      %261 = arith.addf %259, %260 : vector<8x128xf32>
      %cst_21 = arith.constant 9.99999997E-7 : f32
      %262 = vector.broadcast %cst_21 : f32 to vector<8x128xf32>
      %263 = arith.maximumf %256, %262 : vector<8x128xf32>
      %264 = tpu.reciprocal %263 {approx = true} : vector<8x128xf32> -> vector<8x128xf32>
      %265 = arith.mulf %261, %264 : vector<8x128xf32>
      %266 = arith.addf %102, %252 : vector<8x128xf32>
      %cst_22 = arith.constant 5.000000e-01 : f32
      %267 = vector.broadcast %cst_22 : f32 to vector<8x128xf32>
      %268 = arith.mulf %267, %266 : vector<8x128xf32>
      %269 = arith.select %258, %265, %268 : vector<8x128xi1>, vector<8x128xf32>
      %c1_23 = arith.constant 1 : index
      %270 = memref.load %arg2[%c1_23] : memref<150xf32, #tpu.memory_space<smem>>
      %271 = vector.broadcast %270 : f32 to vector<8x128xf32>
      %c2 = arith.constant 2 : index
      %272 = memref.load %arg2[%c2] : memref<150xf32, #tpu.memory_space<smem>>
      %273 = vector.broadcast %272 : f32 to vector<8x128xf32>
      %c0_24 = arith.constant 0 : index
      %274 = memref.load %arg2[%c0_24] : memref<150xf32, #tpu.memory_space<smem>>
      %c5 = arith.constant 5 : index
      %275 = memref.load %arg2[%c5] : memref<150xf32, #tpu.memory_space<smem>>
      %276 = vector.broadcast %274 : f32 to vector<8x128xf32>
      %277 = arith.maximumf %276, %4 : vector<8x128xf32>
      %278 = vector.broadcast %275 : f32 to vector<8x128xf32>
      %279 = arith.minimumf %278, %277 : vector<8x128xf32>
      %280 = vector.broadcast %274 : f32 to vector<8x128xf32>
      %281 = arith.subf %279, %280 : vector<8x128xf32>
      %c3 = arith.constant 3 : index
      %282 = memref.load %arg2[%c3] : memref<150xf32, #tpu.memory_space<smem>>
      %283 = vector.broadcast %282 : f32 to vector<8x128xf32>
      %284 = arith.mulf %281, %283 : vector<8x128xf32>
      %285 = arith.addf %271, %284 : vector<8x128xf32>
      %c4 = arith.constant 4 : index
      %286 = memref.load %arg2[%c4] : memref<150xf32, #tpu.memory_space<smem>>
      %287 = vector.broadcast %286 : f32 to vector<8x128xf32>
      %288 = arith.mulf %281, %287 : vector<8x128xf32>
      %289 = arith.addf %273, %288 : vector<8x128xf32>
      %c5_25 = arith.constant 5 : index
      %290 = memref.load %arg2[%c5_25] : memref<150xf32, #tpu.memory_space<smem>>
      %c10 = arith.constant 10 : index
      %291 = memref.load %arg2[%c10] : memref<150xf32, #tpu.memory_space<smem>>
      %292 = vector.broadcast %290 : f32 to vector<8x128xf32>
      %293 = arith.maximumf %292, %4 : vector<8x128xf32>
      %294 = vector.broadcast %291 : f32 to vector<8x128xf32>
      %295 = arith.minimumf %294, %293 : vector<8x128xf32>
      %296 = vector.broadcast %290 : f32 to vector<8x128xf32>
      %297 = arith.subf %295, %296 : vector<8x128xf32>
      %c8 = arith.constant 8 : index
      %298 = memref.load %arg2[%c8] : memref<150xf32, #tpu.memory_space<smem>>
      %299 = vector.broadcast %298 : f32 to vector<8x128xf32>
      %300 = arith.mulf %297, %299 : vector<8x128xf32>
      %301 = arith.addf %285, %300 : vector<8x128xf32>
      %c9 = arith.constant 9 : index
      %302 = memref.load %arg2[%c9] : memref<150xf32, #tpu.memory_space<smem>>
      %303 = vector.broadcast %302 : f32 to vector<8x128xf32>
      %304 = arith.mulf %297, %303 : vector<8x128xf32>
      %305 = arith.addf %289, %304 : vector<8x128xf32>
      %c10_26 = arith.constant 10 : index
      %306 = memref.load %arg2[%c10_26] : memref<150xf32, #tpu.memory_space<smem>>
      %c15 = arith.constant 15 : index
      %307 = memref.load %arg2[%c15] : memref<150xf32, #tpu.memory_space<smem>>
      %308 = vector.broadcast %306 : f32 to vector<8x128xf32>
      %309 = arith.maximumf %308, %4 : vector<8x128xf32>
      %310 = vector.broadcast %307 : f32 to vector<8x128xf32>
      %311 = arith.minimumf %310, %309 : vector<8x128xf32>
      %312 = vector.broadcast %306 : f32 to vector<8x128xf32>
      %313 = arith.subf %311, %312 : vector<8x128xf32>
      %c13 = arith.constant 13 : index
      %314 = memref.load %arg2[%c13] : memref<150xf32, #tpu.memory_space<smem>>
      %315 = vector.broadcast %314 : f32 to vector<8x128xf32>
      %316 = arith.mulf %313, %315 : vector<8x128xf32>
      %317 = arith.addf %301, %316 : vector<8x128xf32>
      %c14 = arith.constant 14 : index
      %318 = memref.load %arg2[%c14] : memref<150xf32, #tpu.memory_space<smem>>
      %319 = vector.broadcast %318 : f32 to vector<8x128xf32>
      %320 = arith.mulf %313, %319 : vector<8x128xf32>
      %321 = arith.addf %305, %320 : vector<8x128xf32>
      %c15_27 = arith.constant 15 : index
      %322 = memref.load %arg2[%c15_27] : memref<150xf32, #tpu.memory_space<smem>>
      %c20 = arith.constant 20 : index
      %323 = memref.load %arg2[%c20] : memref<150xf32, #tpu.memory_space<smem>>
      %324 = vector.broadcast %322 : f32 to vector<8x128xf32>
      %325 = arith.maximumf %324, %4 : vector<8x128xf32>
      %326 = vector.broadcast %323 : f32 to vector<8x128xf32>
      %327 = arith.minimumf %326, %325 : vector<8x128xf32>
      %328 = vector.broadcast %322 : f32 to vector<8x128xf32>
      %329 = arith.subf %327, %328 : vector<8x128xf32>
      %c18 = arith.constant 18 : index
      %330 = memref.load %arg2[%c18] : memref<150xf32, #tpu.memory_space<smem>>
      %331 = vector.broadcast %330 : f32 to vector<8x128xf32>
      %332 = arith.mulf %329, %331 : vector<8x128xf32>
      %333 = arith.addf %317, %332 : vector<8x128xf32>
      %c19 = arith.constant 19 : index
      %334 = memref.load %arg2[%c19] : memref<150xf32, #tpu.memory_space<smem>>
      %335 = vector.broadcast %334 : f32 to vector<8x128xf32>
      %336 = arith.mulf %329, %335 : vector<8x128xf32>
      %337 = arith.addf %321, %336 : vector<8x128xf32>
      %c20_28 = arith.constant 20 : index
      %338 = memref.load %arg2[%c20_28] : memref<150xf32, #tpu.memory_space<smem>>
      %c25 = arith.constant 25 : index
      %339 = memref.load %arg2[%c25] : memref<150xf32, #tpu.memory_space<smem>>
      %340 = vector.broadcast %338 : f32 to vector<8x128xf32>
      %341 = arith.maximumf %340, %4 : vector<8x128xf32>
      %342 = vector.broadcast %339 : f32 to vector<8x128xf32>
      %343 = arith.minimumf %342, %341 : vector<8x128xf32>
      %344 = vector.broadcast %338 : f32 to vector<8x128xf32>
      %345 = arith.subf %343, %344 : vector<8x128xf32>
      %c23 = arith.constant 23 : index
      %346 = memref.load %arg2[%c23] : memref<150xf32, #tpu.memory_space<smem>>
      %347 = vector.broadcast %346 : f32 to vector<8x128xf32>
      %348 = arith.mulf %345, %347 : vector<8x128xf32>
      %349 = arith.addf %333, %348 : vector<8x128xf32>
      %c24 = arith.constant 24 : index
      %350 = memref.load %arg2[%c24] : memref<150xf32, #tpu.memory_space<smem>>
      %351 = vector.broadcast %350 : f32 to vector<8x128xf32>
      %352 = arith.mulf %345, %351 : vector<8x128xf32>
      %353 = arith.addf %337, %352 : vector<8x128xf32>
      %c25_29 = arith.constant 25 : index
      %354 = memref.load %arg2[%c25_29] : memref<150xf32, #tpu.memory_space<smem>>
      %c30 = arith.constant 30 : index
      %355 = memref.load %arg2[%c30] : memref<150xf32, #tpu.memory_space<smem>>
      %356 = vector.broadcast %354 : f32 to vector<8x128xf32>
      %357 = arith.maximumf %356, %4 : vector<8x128xf32>
      %358 = vector.broadcast %355 : f32 to vector<8x128xf32>
      %359 = arith.minimumf %358, %357 : vector<8x128xf32>
      %360 = vector.broadcast %354 : f32 to vector<8x128xf32>
      %361 = arith.subf %359, %360 : vector<8x128xf32>
      %c28 = arith.constant 28 : index
      %362 = memref.load %arg2[%c28] : memref<150xf32, #tpu.memory_space<smem>>
      %363 = vector.broadcast %362 : f32 to vector<8x128xf32>
      %364 = arith.mulf %361, %363 : vector<8x128xf32>
      %365 = arith.addf %349, %364 : vector<8x128xf32>
      %c29 = arith.constant 29 : index
      %366 = memref.load %arg2[%c29] : memref<150xf32, #tpu.memory_space<smem>>
      %367 = vector.broadcast %366 : f32 to vector<8x128xf32>
      %368 = arith.mulf %361, %367 : vector<8x128xf32>
      %369 = arith.addf %353, %368 : vector<8x128xf32>
      %c30_30 = arith.constant 30 : index
      %370 = memref.load %arg2[%c30_30] : memref<150xf32, #tpu.memory_space<smem>>
      %c35 = arith.constant 35 : index
      %371 = memref.load %arg2[%c35] : memref<150xf32, #tpu.memory_space<smem>>
      %372 = vector.broadcast %370 : f32 to vector<8x128xf32>
      %373 = arith.maximumf %372, %4 : vector<8x128xf32>
      %374 = vector.broadcast %371 : f32 to vector<8x128xf32>
      %375 = arith.minimumf %374, %373 : vector<8x128xf32>
      %376 = vector.broadcast %370 : f32 to vector<8x128xf32>
      %377 = arith.subf %375, %376 : vector<8x128xf32>
      %c33 = arith.constant 33 : index
      %378 = memref.load %arg2[%c33] : memref<150xf32, #tpu.memory_space<smem>>
      %379 = vector.broadcast %378 : f32 to vector<8x128xf32>
      %380 = arith.mulf %377, %379 : vector<8x128xf32>
      %381 = arith.addf %365, %380 : vector<8x128xf32>
      %c34 = arith.constant 34 : index
      %382 = memref.load %arg2[%c34] : memref<150xf32, #tpu.memory_space<smem>>
      %383 = vector.broadcast %382 : f32 to vector<8x128xf32>
      %384 = arith.mulf %377, %383 : vector<8x128xf32>
      %385 = arith.addf %369, %384 : vector<8x128xf32>
      %386 = arith.mulf %16, %269 : vector<8x128xf32>
      %387 = arith.mulf %385, %381 : vector<8x128xf32>
      %cst_31 = arith.constant 9.99999996E-13 : f32
      %388 = vector.broadcast %cst_31 : f32 to vector<8x128xf32>
      %389 = arith.maximumf %387, %388 : vector<8x128xf32>
      %390 = tpu.reciprocal %389 {approx = true} : vector<8x128xf32> -> vector<8x128xf32>
      %391 = arith.mulf %386, %390 : vector<8x128xf32>
      %cst_32 = arith.constant 0.000000e+00 : f32
      %392 = vector.broadcast %cst_32 : f32 to vector<8x128xf32>
      %393 = arith.maximumf %391, %392 : vector<8x128xf32>
      %c0_33 = arith.constant 0 : index
      %c0_34 = arith.constant 0 : index
      %394 = arith.index_cast %2 : i32 to index
      %395 = vector.load %arg10[%c0_33, %c0_34, %394] : memref<3x8x896xf32, #tpu.memory_space<vmem>>, vector<1x8x128xf32>
      %396 = vector.shape_cast %395 : vector<1x8x128xf32> to vector<8x128xf32>
      %397 = vector.shape_cast %393 : vector<8x128xf32> to vector<1x8x128xf32>
      tpu.vector_store %arg10[%c0_33, %c0_34, %394], %397 {strides = array<i32>} : memref<3x8x896xf32, #tpu.memory_space<vmem>>, vector<1x8x128xf32>,
      %c61 = arith.constant 61 : index
      %398 = memref.load %arg2[%c61] : memref<150xf32, #tpu.memory_space<smem>>
      %399 = vector.broadcast %398 : f32 to vector<8x128xf32>
      %c62 = arith.constant 62 : index
      %400 = memref.load %arg2[%c62] : memref<150xf32, #tpu.memory_space<smem>>
      %401 = vector.broadcast %400 : f32 to vector<8x128xf32>
      %c60 = arith.constant 60 : index
      %402 = memref.load %arg2[%c60] : memref<150xf32, #tpu.memory_space<smem>>
      %c65 = arith.constant 65 : index
      %403 = memref.load %arg2[%c65] : memref<150xf32, #tpu.memory_space<smem>>
      %404 = vector.broadcast %402 : f32 to vector<8x128xf32>
      %405 = arith.maximumf %404, %4 : vector<8x128xf32>
      %406 = vector.broadcast %403 : f32 to vector<8x128xf32>
      %407 = arith.minimumf %406, %405 : vector<8x128xf32>
      %408 = vector.broadcast %402 : f32 to vector<8x128xf32>
      %409 = arith.subf %407, %408 : vector<8x128xf32>
      %c63 = arith.constant 63 : index
      %410 = memref.load %arg2[%c63] : memref<150xf32, #tpu.memory_space<smem>>
      %411 = vector.broadcast %410 : f32 to vector<8x128xf32>
      %412 = arith.mulf %409, %411 : vector<8x128xf32>
      %413 = arith.addf %399, %412 : vector<8x128xf32>
      %c64 = arith.constant 64 : index
      %414 = memref.load %arg2[%c64] : memref<150xf32, #tpu.memory_space<smem>>
      %415 = vector.broadcast %414 : f32 to vector<8x128xf32>
      %416 = arith.mulf %409, %415 : vector<8x128xf32>
      %417 = arith.addf %401, %416 : vector<8x128xf32>
      %c65_35 = arith.constant 65 : index
      %418 = memref.load %arg2[%c65_35] : memref<150xf32, #tpu.memory_space<smem>>
      %c70 = arith.constant 70 : index
      %419 = memref.load %arg2[%c70] : memref<150xf32, #tpu.memory_space<smem>>
      %420 = vector.broadcast %418 : f32 to vector<8x128xf32>
      %421 = arith.maximumf %420, %4 : vector<8x128xf32>
      %422 = vector.broadcast %419 : f32 to vector<8x128xf32>
      %423 = arith.minimumf %422, %421 : vector<8x128xf32>
      %424 = vector.broadcast %418 : f32 to vector<8x128xf32>
      %425 = arith.subf %423, %424 : vector<8x128xf32>
      %c68 = arith.constant 68 : index
      %426 = memref.load %arg2[%c68] : memref<150xf32, #tpu.memory_space<smem>>
      %427 = vector.broadcast %426 : f32 to vector<8x128xf32>
      %428 = arith.mulf %425, %427 : vector<8x128xf32>
      %429 = arith.addf %413, %428 : vector<8x128xf32>
      %c69 = arith.constant 69 : index
      %430 = memref.load %arg2[%c69] : memref<150xf32, #tpu.memory_space<smem>>
      %431 = vector.broadcast %430 : f32 to vector<8x128xf32>
      %432 = arith.mulf %425, %431 : vector<8x128xf32>
      %433 = arith.addf %417, %432 : vector<8x128xf32>
      %c70_36 = arith.constant 70 : index
      %434 = memref.load %arg2[%c70_36] : memref<150xf32, #tpu.memory_space<smem>>
      %c75 = arith.constant 75 : index
      %435 = memref.load %arg2[%c75] : memref<150xf32, #tpu.memory_space<smem>>
      %436 = vector.broadcast %434 : f32 to vector<8x128xf32>
      %437 = arith.maximumf %436, %4 : vector<8x128xf32>
      %438 = vector.broadcast %435 : f32 to vector<8x128xf32>
      %439 = arith.minimumf %438, %437 : vector<8x128xf32>
      %440 = vector.broadcast %434 : f32 to vector<8x128xf32>
      %441 = arith.subf %439, %440 : vector<8x128xf32>
      %c73 = arith.constant 73 : index
      %442 = memref.load %arg2[%c73] : memref<150xf32, #tpu.memory_space<smem>>
      %443 = vector.broadcast %442 : f32 to vector<8x128xf32>
      %444 = arith.mulf %441, %443 : vector<8x128xf32>
      %445 = arith.addf %429, %444 : vector<8x128xf32>
      %c74 = arith.constant 74 : index
      %446 = memref.load %arg2[%c74] : memref<150xf32, #tpu.memory_space<smem>>
      %447 = vector.broadcast %446 : f32 to vector<8x128xf32>
      %448 = arith.mulf %441, %447 : vector<8x128xf32>
      %449 = arith.addf %433, %448 : vector<8x128xf32>
      %c75_37 = arith.constant 75 : index
      %450 = memref.load %arg2[%c75_37] : memref<150xf32, #tpu.memory_space<smem>>
      %c80 = arith.constant 80 : index
      %451 = memref.load %arg2[%c80] : memref<150xf32, #tpu.memory_space<smem>>
      %452 = vector.broadcast %450 : f32 to vector<8x128xf32>
      %453 = arith.maximumf %452, %4 : vector<8x128xf32>
      %454 = vector.broadcast %451 : f32 to vector<8x128xf32>
      %455 = arith.minimumf %454, %453 : vector<8x128xf32>
      %456 = vector.broadcast %450 : f32 to vector<8x128xf32>
      %457 = arith.subf %455, %456 : vector<8x128xf32>
      %c78 = arith.constant 78 : index
      %458 = memref.load %arg2[%c78] : memref<150xf32, #tpu.memory_space<smem>>
      %459 = vector.broadcast %458 : f32 to vector<8x128xf32>
      %460 = arith.mulf %457, %459 : vector<8x128xf32>
      %461 = arith.addf %445, %460 : vector<8x128xf32>
      %c79 = arith.constant 79 : index
      %462 = memref.load %arg2[%c79] : memref<150xf32, #tpu.memory_space<smem>>
      %463 = vector.broadcast %462 : f32 to vector<8x128xf32>
      %464 = arith.mulf %457, %463 : vector<8x128xf32>
      %465 = arith.addf %449, %464 : vector<8x128xf32>
      %c80_38 = arith.constant 80 : index
      %466 = memref.load %arg2[%c80_38] : memref<150xf32, #tpu.memory_space<smem>>
      %c85 = arith.constant 85 : index
      %467 = memref.load %arg2[%c85] : memref<150xf32, #tpu.memory_space<smem>>
      %468 = vector.broadcast %466 : f32 to vector<8x128xf32>
      %469 = arith.maximumf %468, %4 : vector<8x128xf32>
      %470 = vector.broadcast %467 : f32 to vector<8x128xf32>
      %471 = arith.minimumf %470, %469 : vector<8x128xf32>
      %472 = vector.broadcast %466 : f32 to vector<8x128xf32>
      %473 = arith.subf %471, %472 : vector<8x128xf32>
      %c83 = arith.constant 83 : index
      %474 = memref.load %arg2[%c83] : memref<150xf32, #tpu.memory_space<smem>>
      %475 = vector.broadcast %474 : f32 to vector<8x128xf32>
      %476 = arith.mulf %473, %475 : vector<8x128xf32>
      %477 = arith.addf %461, %476 : vector<8x128xf32>
      %c84 = arith.constant 84 : index
      %478 = memref.load %arg2[%c84] : memref<150xf32, #tpu.memory_space<smem>>
      %479 = vector.broadcast %478 : f32 to vector<8x128xf32>
      %480 = arith.mulf %473, %479 : vector<8x128xf32>
      %481 = arith.addf %465, %480 : vector<8x128xf32>
      %482 = arith.mulf %16, %248 : vector<8x128xf32>
      %483 = arith.mulf %481, %477 : vector<8x128xf32>
      %cst_39 = arith.constant 9.99999996E-13 : f32
      %484 = vector.broadcast %cst_39 : f32 to vector<8x128xf32>
      %485 = arith.maximumf %483, %484 : vector<8x128xf32>
      %486 = tpu.reciprocal %485 {approx = true} : vector<8x128xf32> -> vector<8x128xf32>
      %487 = arith.mulf %482, %486 : vector<8x128xf32>
      %c0_40 = arith.constant 0 : index
      %488 = arith.index_cast %2 : i32 to index
      %489 = vector.load %arg6[%c0_40, %488] : memref<8x896xf32, #tpu.memory_space<vmem>>, vector<8x128xf32>
      %490 = arith.mulf %489, %391 : vector<8x128xf32>
      %491 = arith.addf %487, %490 : vector<8x128xf32>
      %cst_41 = arith.constant 0.000000e+00 : f32
      %492 = vector.broadcast %cst_41 : f32 to vector<8x128xf32>
      %493 = arith.maximumf %491, %492 : vector<8x128xf32>
      %c2_42 = arith.constant 2 : index
      %c0_43 = arith.constant 0 : index
      %494 = arith.index_cast %2 : i32 to index
      %495 = vector.load %arg10[%c2_42, %c0_43, %494] : memref<3x8x896xf32, #tpu.memory_space<vmem>>, vector<1x8x128xf32>
      %496 = vector.shape_cast %495 : vector<1x8x128xf32> to vector<8x128xf32>
      %497 = vector.shape_cast %493 : vector<8x128xf32> to vector<1x8x128xf32>
      tpu.vector_store %arg10[%c2_42, %c0_43, %494], %497 {strides = array<i32>} : memref<3x8x896xf32, #tpu.memory_space<vmem>>, vector<1x8x128xf32>,
    }
    %c7_i32_0 = arith.constant 7 : i32
    return
  }
  func.func @transform_0(%arg0: i32, %arg1: i32) -> i32 {
    %c0_i32 = arith.constant 0 : i32
    %c0_i32_0 = arith.constant 0 : i32
    return %c0_i32 : i32
  }
  func.func @transform_1(%arg0: i32, %arg1: i32) -> (i32, i32) {
    %c0_i32 = arith.constant 0 : i32
    return %arg0, %arg1 : i32, i32
  }
  func.func @transform_2(%arg0: i32, %arg1: i32) -> (i32, i32) {
    %c0_i32 = arith.constant 0 : i32
    return %arg0, %arg1 : i32, i32
  }
  func.func @transform_3(%arg0: i32, %arg1: i32) -> (i32, i32) {
    %c0_i32 = arith.constant 0 : i32
    return %arg0, %arg1 : i32, i32
  }
  func.func @transform_4(%arg0: i32, %arg1: i32) -> (i32, i32) {
    %c0_i32 = arith.constant 0 : i32
    return %arg0, %arg1 : i32, i32
  }
  func.func @transform_5(%arg0: i32, %arg1: i32) -> (i32, i32) {
    %c0_i32 = arith.constant 0 : i32
    return %arg0, %arg1 : i32, i32
  }
  func.func @transform_6(%arg0: i32, %arg1: i32) -> (i32, i32) {
    %c0_i32 = arith.constant 0 : i32
    return %arg0, %arg1 : i32, i32
  }
  func.func @transform_7(%arg0: i32, %arg1: i32) -> (i32, i32) {
    %c0_i32 = arith.constant 0 : i32
    return %arg0, %arg1 : i32, i32
  }
  func.func @transform_8(%arg0: i32, %arg1: i32) -> (i32, i32, i32) {
    %c0_i32 = arith.constant 0 : i32
    %c0_i32_0 = arith.constant 0 : i32
    return %c0_i32, %arg0, %arg1 : i32, i32, i32
  }
}

</mosaic_0001>

<bundles_post_ra>
// kernel: rates_forward.1
= control target key start
LH: loop header
LB: loop body
LE: loop exit
PB: predicated region body
PF: predicated region fallthrough
CT: control target
= control target key end

     0   :  { %s3464_s0 = inlined_call_operand.vmem [shape: f32[150], index: 0, kind: input, shape index: {}]   ;;  %s3465_s1 = inlined_call_operand.vmem [shape: f32[9,1000], index: 1, kind: input, shape index: {}]   ;;  %s3466_s2 = inlined_call_operand.vmem [shape: f32[9,1000], index: 2, kind: input, shape index: {}]   ;;  %s3467_s3 = inlined_call_operand.vmem [shape: f32[9,1000], index: 3, kind: input, shape index: {}]   ;;  %s3468_s4 = inlined_call_operand.vmem [shape: f32[9,1000], index: 4, kind: input, shape index: {}]   ;;  %s3469_s5 = inlined_call_operand.vmem [shape: f32[9,1000], index: 5, kind: input, shape index: {}]   ;;  %s3470_s6 = inlined_call_operand.vmem [shape: f32[9,1000], index: 6, kind: input, shape index: {}]   ;;  %s3471_s7 = inlined_call_operand.vmem [shape: f32[9,1000], index: 7, kind: input, shape index: {}]   ;;  %s3472_s8 = inlined_call_operand.vmem [shape: f32[3,9,1000], index: 8, kind: output, shape index: {}]  }
   0x1   :  { %3485 = sst [smem:[#allocation20_spill]] %s3464_s0 }
   0x2   :  { %3486 = sst [smem:[#allocation21_spill]] %s3465_s1 }
   0x3   :  { %3487 = sst [smem:[#allocation22_spill]] %s3466_s2 }
   0x4   :  { %3488 = sst [smem:[#allocation23_spill]] %s3468_s4 }
   0x5   :  { %3489 = sst [smem:[#allocation24_spill]] %s3472_s8 }
   0x6   :  { %13 = vsyncpa [#allocation3], 0  ;;  %s2540_s27 = smov 0   ;;  %s2542_s28 = smov 0  }
   0x7   :  { %s2544_s29 = smov 0   ;;  %s2546_s30 = smov 0  }
   0x8   :  { %s2548_s9 = smov 0   ;;  %s2550_s10 = smov 0  }
   0x9   :  { %s2552_s11 = smov 0  }
   0xa LB: > { %3490 = sst [smem:[#allocation6_spill]] %s2402_s28  ;;  %s1910_s12 = sadd.s32 4294967295, %s2422_s11   ;;  %s2422_s11 = sphi %s2552_s11, %s19_s11   ;;  %s2418_s10 = sphi %s2550_s10, %s3555_s10   ;;  %s2414_s9 = sphi %s2548_s9, %s3554_s9   ;;  %s2410_s30 = sphi %s2546_s30, %s3553_s30   ;;  %s2406_s29 = sphi %s2544_s29, %s3552_s29   ;;  %s2402_s28 = sphi %s2542_s28, %s3551_s28   ;;  %s2398_s27 = sphi %s2540_s27, %s3550_s27  }
   0xb   : > { %3491 = sst [smem:[#allocation7_spill]] %s2410_s30  ;;  %s28_s13 = sadd.s32 1, %s2414_s9 }
   0xc   : > { %3492 = sst [smem:[#allocation8_spill]] %s2414_s9  ;;  %p29_p0 = scmp.ge.s32.totalorder %s28_s13, 2 }
   0xd   : > { %3493 = sst [smem:[#allocation9_spill]] %s2418_s10  ;;  %s31_s14 = sadd.s32 1, %s2418_s10 }
   0xe   : > { %3494 = sst [smem:[#allocation10_spill]] %s2422_s11  ;;  %s257_s15 = sadd.s32 1, %s2402_s28 }
   0xf   : > { %p267_p1 = scmp.ne.s32.totalorder %s2402_s28, %s2398_s27  ;;  %s3557_s13 = smov (%p29_p0, %s28_s13), 0 }
  0x10   : > { %3495 = sst [smem:[#allocation11_spill]] %s3557_s13  ;;  %s3559_s14 = smov (!%p29_p0, %s31_s14), %s2418_s10 }
  0x11   : > { %s253_s16 = ssub.s32 %s2414_s9, %s3557_s13  ;;  %p268_p2 = scmp.eq.s32.totalorder %s1910_s12, 3 }
  0x12   : > { %p33_p3 = scmp.ge.s32.totalorder %s3559_s14, 2  ;;  %p1912_p4 = scmp.ge.s32.totalorder %s2422_s11, 1 }
  0x13   : > { %p2587_p5 = por %p268_p2, %p267_p1  ;;  %p281_p6 = scmp.lt.s32.totalorder %s2422_s11, 5 }
  0x14   : > { %s3561_s14 = smov (%p33_p3, %s3559_s14), 0  ;;  %p2600_p8 = scmp.eq.s32.totalorder %s1910_s12, 0 }
  0x15   : > { %s3496_s17 = scalar_select %p2587_p5, 1, 0 }
  0x16   : > { %3498 = sst [smem:[#allocation13_spill]] %s3561_s14  ;;  %p2594_p7 = pnand %p1912_p4, %p281_p6 }
  0x17   : > { %3497 = sst [smem:[#allocation12_spill]] %s3496_s17  ;;  %s252_s19 = ssub.s32 %s2418_s10, %s3561_s14 }
  0x18   : > { %s254_s21 = sor.u32 %s253_s16, %s252_s19  ;;  %p2062_p9 = pneg %p2594_p7 }
  0x19   : > { %p255_p10 = scmp.eq.s32.totalorder %s254_s21, 0  ;;  %s3501_s0 = sld [smem:[#allocation20_spill]] }
  0x1a   : > { %p2063_p11 = pnand %p2600_p8, %p2062_p9 }
  0x1b   : > { %s2612_s25 = scalar_select %p255_p10, %s2402_s28, %s257_s15  }
  0x1c   : > { %p2283_p13 = pneg %p2063_p11 }
  0x1d   : > { %3502 = sst [smem:[#allocation14_spill]] %s2612_s25 }
  0x1f   : > { %s294_s24 = sshll.u32 %s3501_s0, 4  ;;  %s295_s24 = int_to_ptr.vmem [resolvable:$true] %s294_s24 }
  0x20   : > { %s2281_s26 = scalar_lea.vmem %s295_s24, 32  ;;  %p2289_p2 = scmp.lt.s32.totalorder %s295_s24, %s295_s24 }
  0x21   : > { %p2282_p12 = scmp.ne.s32.totalorder %s295_s24, %s2281_s26  ;;  %p2290_p3 = scmp.lt.s32.totalorder %s2281_s26, %s2281_s26 }
  0x23   : > { %p2284_p0 = pnand %p2283_p13, %p2282_p12  ;;  %p2291_p4 = por %p2290_p3, %p2289_p2 }
  0x25   : > { %p2285_p1 = pneg %p2284_p0 }
  0x27   : > { %p2292_p6 = pnand %p2291_p4, %p2285_p1 }
  0x29   : > { %2295 = shalt.err (!%p2292_p6)
}
  0x2a   : > { %s2492_s12 = smov [#allocation2]   ;;  %454 = sbr.rel (%p2594_p7) target bundleno = 380 (0x17c), region = 52 }
  0x2b   : > { %2065 = dma.vmem_to_smem (!%p2063_p11), %s295_s24, 32, %s2492_s12, [#allocation3]  }
  0x2f   : > { %2393 = dma.done.wait (%p2600_p8), [#allocation3], 32  }
  0x30   : > { %2395 = vsyncadd (%p2600_p8), [#allocation3], 4294967264 }
  0x31   : > { %460 = sfence }
  0x32   : > { %s571_s15 = sand.u32 1, %s2398_s27   ;;  %s2622_s16 = smul.u32 7, %s2406_s29 }
  0x33   : > { %s2057_s19 = smul.u32 168, %s571_s15  ;;  %p579_p9 = scmp.lt.s32.totalorder %s2410_s30, 1 }
  0x34   : > { %3503 = sst [smem:[#allocation15_spill]] %s2622_s16  ;;  %p581_p10 = scmp.lt.s32.totalorder %s2622_s16, 7 }
  0x35   : > { %s580_s18 = scalar_select %p579_p9, %s2410_s30, 1 }
  0x36   : > { %s582_s21 = scalar_select %p581_p10, %s2622_s16, 7 }
  0x37   : > { %s1917_s22 = sshll.u32 %s580_s18, 3  ;;  %s2658_s12 = scalar_lea.vmem [#allocation4], %s2057_s19  }
  0x38   : > { %s584_s23 = sadd.s32 %s1917_s22, %s582_s21  ;;  %3507 = sst [smem:[#allocation16_spill]] %s2658_s12 }
  0x39   : > { %s2628_s24 = sshll.u32 %s584_s23, 3  ;;  %s2660_s0 = smov 0  }
  0x3a LB: >> { %3508 = sst [smem:[#allocation17_spill]] %s2426_s0  ;;  %s1931_s18 = sshll.u32 %s2426_s0, 7  ;;  %s2426_s0 = sphi %s2660_s0, %s710_s0  }
  0x3b   : >> { %s2666_s22 = sld [smem:[#allocation2 + $0x5b]]  ;;  %s712_s23 = sshra.s32 %s1931_s18, 7 }
  0x3c   : >> { %s2668_s9 = sld [smem:[#allocation2 + $0x5c]]  ;;  %s2674_s20 = sshll.u32 %s712_s23, 3 }
  0x3d   : >> { %s1939_s10 = sld [smem:[#allocation2 + $0x5a]] }
  0x3e   : >> { %s1940_s28 = sld [smem:[#allocation2 + $0x5f]] }
  0x3f   : >> { %s2670_s25 = sld [smem:[#allocation2 + $0x5d]] }
  0x40   : >> { %s2672_s19 = sld [smem:[#allocation2 + $0x5e]] }
  0x41   : >> { %s1943_s26 = sld [smem:[#allocation2 + $0x64]]  ;;  %v735_v13 = vstv %s2666_s22 }
  0x42   : >> { %s3509_s2 = sld [smem:[#allocation22_spill]]  ;;  %v737_v19 = vstv %s2668_s9 }
  0x43   : >> { %s2682_s21 = sld [smem:[#allocation2 + $0x62]]  ;;  %v2690_v1 = vstv %s1939_s10 }
  0x44   : >> { %s2684_s13 = sld [smem:[#allocation2 + $0x63]]  ;;  %v742_v3 = vstv %s1940_s28 }
  0x45   : >> { %s2686_s11 = sld [smem:[#allocation2 + $0x69]]  ;;  %v746_v7 = vstv %s2670_s25 }
  0x46   : >> { %s2692_s18 = sld [smem:[#allocation2 + $0x67]]  ;;  %v750_v51 = vstv %s2672_s19 }
  0x47   : >> { %s2694_s23 = sld [smem:[#allocation2 + $0x68]]  ;;  %v755_v6 = vstv %s1943_s26 }
  0x48   : >> { %s3510_s15 = scalar_lea.vmem %s3509_s2, %s2628_s24  ;;  %s2696_s14 = sld [smem:[#allocation2 + $0x6e]] }
  0x49   : >> { %s732_s29 = scalar_lea.vmem %s3510_s15, %s2674_s20  ;;  %s2700_s27 = sld [smem:[#allocation2 + $0x6c]]  ;;  %v759_v16 = vstv %s2682_s21 }
  0x4a   : >> { %v2688_v0 = vld [vmem:[%s732_s29] sm:$0xff]  ;;  %s2702_s15 = sld [smem:[#allocation2 + $0x6d]] }
  0x4b   : >> { %v741_v2 = vmax.f32 %v2690_v1, %v2688_v0  ;;  %s2704_s29 = sld [smem:[#allocation2 + $0x73]]  ;;  %v754_v5 = vmax.f32 %v742_v3, %v2688_v0  ;;  %v767_v11 = vmax.f32 %v755_v6, %v2688_v0  ;;  %v2735_v14 = vstv %s2686_s11 }
  0x4c   : >> { %s2706_s10 = sld [smem:[#allocation2 + $0x29]]  ;;  %v780_v24 = vmax.f32 %v2735_v14, %v2688_v0  ;;  %v772_v44 = vstv %s2692_s18 }
  0x4d   : >> { %3511 = sst [smem:[#allocation18_spill]] %s2694_s23  ;;  %v743_v4 = vmin.f32 %v742_v3, %v741_v2  ;;  %v756_v9 = vmin.f32 %v755_v6, %v754_v5  ;;  %v769_v23 = vmin.f32 %v2735_v14, %v767_v11 }
  0x4e   : >> { %s2708_s2 = sld [smem:[#allocation2 + $0x2a]]  ;;  %v2769_v31 = vstv %s2696_s14 }
  0x4f   : >> { %s2711_s8 = sld [smem:[#allocation2 + $0x28]]  ;;  %v2723_v8 = vsub.f32 %v743_v4, %v2690_v1  ;;  %v2751_v20 = vsub.f32 %v756_v9, %v742_v3  ;;  %v2788_v43 = vsub.f32 %v769_v23, %v755_v6  ;;  %v782_v52 = vmin.f32 %v2769_v31, %v780_v24 }
  0x50   : >> { %3512 = sst [smem:[#allocation19_spill]] %s2702_s15  ;;  %v793_v60 = vmax.f32 %v2769_v31, %v2688_v0  ;;  %v785_v2 = vstv %s2700_s27 }
  0x51   : >> { %s1958_s30 = sld [smem:[#allocation2 + $0x2d]]  ;;  %v747_v10 = vmul.f32 %v746_v7, %v2723_v8  ;;  %v760_v27 = vmul.f32 %v759_v16, %v2751_v20  ;;  %v773_v57 = vmul.f32 %v772_v44, %v2788_v43  ;;  %v794_v3 = vstv %s2704_s29 }
  0x52   : >> { %s2714_s28 = sld [smem:[#allocation2 + $0x2b]]  ;;  %v806_v35 = vstv %s2706_s10  ;;  %v2813_v6 = vsub.f32 %v782_v52, %v2735_v14  ;;  %v751_v11 = vmul.f32 %v750_v51, %v2723_v8 }
  0x53   : >> { %s3513_s1 = sld [smem:[#allocation21_spill]]  ;;  %v748_v22 = vadd.f32 %v747_v10, %v735_v13  ;;  %v763_v13 = vstv %s2684_s13 }
  0x54   : >> { %s2725_s12 = sld [smem:[#allocation2 + $0x2c]]  ;;  %v808_v36 = vstv %s2708_s2  ;;  %v786_v14 = vmul.f32 %v785_v2, %v2813_v6 }
  0x55   : >> { %s1961_s26 = sld [smem:[#allocation2 + $0x32]]  ;;  %v811_v15 = vstv %s2711_s8  ;;  %v761_v56 = vadd.f32 %v760_v27, %v748_v22 }
  0x56   : >> { %s2729_s25 = sld [smem:[#allocation2 + $0x30]] }
  0x57   : >> { %s2738_s17 = sld [smem:[#allocation2 + $0x31]]  ;;  %v813_v18 = vstv %s1958_s30 }
  0x58   : >> { %s2748_s23 = sld [smem:[#allocation2 + $0x37]]  ;;  %v817_v28 = vstv %s2714_s28 }
  0x59   : >> { %s3514_s0 = scalar_lea.vmem %s3513_s1, %s2628_s24  ;;  %s3515_s1 = scalar_lea.vmem %s3469_s5, %s2628_s24 }
  0x5a   : >> { %s715_s4 = scalar_lea.vmem %s3514_s0, %s2674_s20  ;;  %s718_s15 = scalar_lea.vmem %s3515_s1, %s2674_s20  ;;  %v821_v29 = vstv %s2725_s12 }
  0x5b   : >> { %v2731_v12 = vld [vmem:[%s715_s4] sm:$0xff]  ;;  %s2754_s4 = sld [smem:[#allocation2 + $0x35]]  ;;  %v826_v30 = vstv %s1961_s26  ;;  %s3516_s12 = scalar_lea.vmem %s3467_s3, %s2628_s24 }
  0x5c   : >> { %v812_v17 = vmax.f32 %v811_v15, %v2731_v12  ;;  %v825_v21 = vmax.f32 %v813_v18, %v2731_v12  ;;  %s2759_s1 = sld [smem:[#allocation2 + $0x36]]  ;;  %v2761_v26 = vld [vmem:[%s718_s15] sm:$0xff]  ;;  %v838_v34 = vmax.f32 %v826_v30, %v2731_v12  ;;  %v830_v37 = vstv %s2729_s25  ;;  %s861_s22 = scalar_lea.vmem %s3516_s12, %s2674_s20 }
  0x5d   : >> { %s2764_s8 = sld [smem:[#allocation2 + $0x71]]  ;;  %v834_v38 = vstv %s2738_s17  ;;  %vm727_vm0 = vcmp.eq.f32.partialorder %v2761_v26, 0.0  ;;  %v2799_v55 = vld [vmem:[%s861_s22] sm:$0xff]  ;;  %s3517_s17 = scalar_lea.vmem %s3471_s7, %s2628_s24 }
  0x5e   : >> { %v814_v25 = vmin.f32 %v813_v18, %v812_v17  ;;  %s2771_s30 = sld [smem:[#allocation2 + $0x72]]  ;;  %v827_v33 = vmin.f32 %v826_v30, %v825_v21  ;;  %v839_v42 = vstv %s2748_s23  ;;  %s721_s16 = scalar_lea.vmem %s3517_s17, %s2674_s20  ;;  %v795_v17 = vmin.f32 %v794_v3, %v793_v60 }
  0x5f   : >> { %s2778_s11 = sld [smem:[#allocation2 + $0x78]]  ;;  %v840_v45 = vmin.f32 %v839_v42, %v838_v34  ;;  %v728_v24 = vsel %vm727_vm0, %v2731_v12, %v2761_v26 }
  0x60   : >> { %v815_v32 = vsub.f32 %v814_v25, %v811_v15  ;;  %v828_v41 = vsub.f32 %v827_v33, %v813_v18  ;;  %s1973_s14 = sld [smem:[#allocation2 + $0x7d]]  ;;  %v774_v15 = vadd.f32 %v773_v57, %v761_v56  ;;  %v722_v33 = vld [vmem:[%s721_s16] sm:$0xff]  ;;  %v796_v26 = vsub.f32 %v795_v17, %v2769_v31 }
  0x61   : >> { %v843_v46 = vstv %s2754_s4  ;;  %s2792_s2 = sld [smem:[#allocation2 + $0x79]]  ;;  %v841_v53 = vsub.f32 %v840_v45, %v826_v30  ;;  %v729_v44 = vsub.f32 %v2731_v12, %v728_v24 }
  0x62   : >> { %v818_v39 = vmul.f32 %v817_v28, %v815_v32  ;;  %v822_v40 = vmul.f32 %v821_v29, %v815_v32  ;;  %v831_v49 = vmul.f32 %v830_v37, %v828_v41  ;;  %v835_v50 = vmul.f32 %v834_v38, %v828_v41  ;;  %s2794_s23 = sld [smem:[#allocation2 + $0x7c]] }
  0x63   : >> { %v847_v54 = vstv %s2759_s1  ;;  %s1976_s18 = sld [smem:[#allocation2 + $0x82]]  ;;  %v844_v61 = vmul.f32 %v843_v46, %v841_v53  ;;  %s3518_s1 = scalar_lea.vmem %s3470_s6, %s2628_s24  ;;  %v752_v28 = vadd.f32 %v751_v11, %v737_v19  ;;  %v764_v29 = vmul.f32 %v763_v13, %v2751_v20 }
  0x64   : >> { %v819_v47 = vadd.f32 %v818_v39, %v806_v35  ;;  %v823_v48 = vadd.f32 %v822_v40, %v808_v36  ;;  %s2802_s10 = sld [smem:[#allocation2 + $0x7a]]  ;;  %v848_v62 = vmul.f32 %v847_v54, %v841_v53  ;;  %v798_v30 = vstv %s2764_s8 }
  0x65   : >> { %v869_v63 = vstv %s2778_s11  ;;  %s2807_s19 = sld [smem:[#allocation2 + $0x7b]]  ;;  %s724_s11 = scalar_lea.vmem %s3518_s1, %s2674_s20  ;;  %v787_v36 = vadd.f32 %v786_v14, %v774_v15  ;;  %v799_v39 = vmul.f32 %v798_v30, %v796_v26  ;;  %v765_v45 = vadd.f32 %v764_v29, %v752_v28 }
  0x66   : >> { %v832_v58 = vadd.f32 %v831_v49, %v819_v47  ;;  %v836_v59 = vadd.f32 %v835_v50, %v823_v48  ;;  %v870_v4 = vmax.f32 %v869_v63, %v2799_v55  ;;  %v871_v5 = vstv %s1973_s14  ;;  %s1979_s28 = sld [smem:[#allocation2 + $0x87]]  ;;  %v725_v34 = vld [vmem:[%s724_s11] sm:$0xff] }
  0x67   : >> { %v883_v10 = vmax.f32 %v871_v5, %v2799_v55  ;;  %s2816_s26 = sld [smem:[#allocation2 + $0x81]]  ;;  %v726_v31 = vmul.f32 %v725_v34, %v722_v33  ;;  %v2879_v48 = vsub.f32 %v2688_v0, %v2690_v1  ;;  %v800_v53 = vadd.f32 %v799_v39, %v787_v36 }
  0x68   : >> { %v845_v7 = vadd.f32 %v844_v61, %v832_v58  ;;  %v849_v9 = vadd.f32 %v848_v62, %v836_v59  ;;  %v872_v16 = vmin.f32 %v871_v5, %v870_v4  ;;  %s2820_s27 = sld [smem:[#allocation2 + $0x80]]  ;;  %v879_v27 = vstv %s2794_s23 }
  0x69   : >> { %v884_v21 = vstv %s1976_s18  ;;  %s2829_s0 = sld [smem:[#allocation2 + $0x8c]]  ;;  %v802_v56 = vstv %s2771_s30  ;;  %v2898_v57 = vadd.f32 %v2879_v48, %v2799_v55 }
  0x6a   : >> { %v851_v18 = vmul.f32 %v849_v9, %v845_v7  ;;  %s3519_s15 = sld [smem:[#allocation18_spill]]  ;;  %v2837_v8 = vsub.f32 %v872_v16, %v869_v63  ;;  %v885_v22 = vmin.f32 %v884_v21, %v883_v10  ;;  %v896_v23 = vmax.f32 %v884_v21, %v2799_v55 }
  0x6b   : >> { %s2840_s21 = sld [smem:[#allocation2 + $0x85]]  ;;  %v866_v40 = vstv %s2802_s10  ;;  %v2918_v7 = vmul.f32 %v802_v56, %v796_v26  ;;  %v942_v9 = vmax.f32 %v2898_v57, 1e-06  ;;  %vm938_vm1 = vcmp.gt.f32.partialorder %v2898_v57, 1e-06 }
  0x6c   : >> { %v852_v25 = vmax.f32 %v851_v18, 1e-12  ;;  %s2847_s12 = sld [smem:[#allocation2 + $0x86]]  ;;  %v897_v32 = vstv %s1979_s28  ;;  %v880_v19 = vmul.f32 %v879_v27, %v2837_v8  ;;  %v2860_v20 = vsub.f32 %v885_v22, %v871_v5 }
  0x6d   : >> { %s2853_s22 = sld [smem:[#allocation2 + $0x8b]]  ;;  %v898_v37 = vmin.f32 %v897_v32, %v896_v23  ;;  %v909_v38 = vmax.f32 %v897_v32, %v2799_v55  ;;  %v892_v41 = vstv %s2816_s26 }
  0x6e   : >> { %2265 = vrcp.f32 %v852_v25  ;;  %s2857_s14 = sld [smem:[#allocation2 + $0x91]]  ;;  %v881_v49 = vadd.f32 %v880_v19, %v866_v40  ;;  %v893_v50 = vmul.f32 %v892_v41, %v2860_v20 }
  0x6f   : >> { %s3520_s9 = sld [smem:[#allocation19_spill]]  ;;  %v2868_v42 = vstv %s2829_s0  ;;  %v2884_v51 = vsub.f32 %v898_v37, %v884_v21  ;;  %2267 = vrcp.f32 %v942_v9 }
  0x70   : >> { %v776_v35 = vstv %s3519_s15  ;;  %s2863_s8 = sld [smem:[#allocation2 + $0x90]]  ;;  %v911_v52 = vmin.f32 %v2868_v42, %v909_v38  ;;  %v894_v58 = vadd.f32 %v893_v50, %v881_v49  ;;  %v922_v61 = vmax.f32 %v2868_v42, %v2799_v55 }
  0x71   : >> { %s2870_s23 = sld [smem:[#allocation2 + $0x1]]  ;;  %v777_v46 = vmul.f32 %v776_v35, %v2788_v43  ;;  %v2890_v43 = vmul.f32 %v729_v44, %v726_v31 }
  0x72   : >> { %s2873_s18 = sld [smem:[#allocation2 + $0x2]]  ;;  %v905_v54 = vstv %s2847_s12  ;;  %v2901_v60 = vsub.f32 %v911_v52, %v897_v32 }
  0x73   : >> { %s2881_s10 = sld [smem:[#allocation2]]  ;;  %v778_v0 = vadd.f32 %v777_v46, %v765_v45  ;;  %v906_v59 = vmul.f32 %v905_v54, %v2884_v51  ;;  %v850_v62 = vmul.f32 %v800_v53, %v2890_v43  ;;  %v918_v63 = vstv %s2853_s22 }
  0x74   : >> { %s1991_s28 = sld [smem:[#allocation2 + $0x5]]  ;;  %v923_v2 = vstv %s2857_s14  ;;  %v919_v15 = vmul.f32 %v918_v63, %v2901_v60 }
  0x75   : >> { %v789_v47 = vstv %s3520_s9  ;;  %s2888_s26 = sld [smem:[#allocation2 + $0x3]]  ;;  %v907_v13 = vadd.f32 %v906_v59, %v894_v58  ;;  %v924_v16 = vmin.f32 %v923_v2, %v922_v61 }
  0x76   : >> { %s2892_s29 = sld [smem:[#allocation2 + $0x4]]  ;;  %v790_v1 = vmul.f32 %v789_v47, %v2813_v6  ;;  %v931_v44 = vstv %s2863_s8 }
  0x77   : >> { %s1994_s25 = sld [smem:[#allocation2 + $0xa]]  ;;  %v949_v23 = vstv %s2870_s23  ;;  %v2947_v26 = vsub.f32 %v924_v16, %v2868_v42  ;;  %v920_v56 = vadd.f32 %v919_v15, %v907_v13 }
  0x78   : >> { %s2905_s17 = sld [smem:[#allocation2 + $0x8]]  ;;  %v2916_v6 = vadd.f32 %v790_v1, %v778_v0  ;;  %v951_v29 = vstv %s2873_s18 }
  0x79   : >> { %v954_v3 = vstv %s2881_s10  ;;  %s2911_s30 = sld [smem:[#allocation2 + $0x9]]  ;;  %v932_v58 = vmul.f32 %v931_v44, %v2947_v26 }
  0x7a   : >> { %v955_v4 = vmax.f32 %v954_v3, %v2731_v12  ;;  %v956_v5 = vstv %s1991_s28  ;;  %s2914_s16 = sld [smem:[#allocation2 + $0xf]]  ;;  %v804_v13 = vadd.f32 %v2918_v7, %v2916_v6 }
  0x7b   : >> { %s3521_s0 = sld [smem:[#allocation16_spill]]  ;;  %v968_v10 = vmax.f32 %v956_v5, %v2731_v12  ;;  %v2266_v11 = vpop.eup %2265  ;;  %v960_v18 = vstv %s2888_s26  ;;  %v933_v7 = vadd.f32 %v932_v58, %v920_v56 }
  0x7c   : >> { %s2922_s13 = sld [smem:[#allocation2 + $0xd]]  ;;  %v957_v14 = vmin.f32 %v956_v5, %v955_v4  ;;  %v854_v17 = vmul.f32 %v2266_v11, %v850_v62  ;;  %v964_v21 = vstv %s2892_s29  ;;  %v2268_v56 = vpop.eup %2267 }
  0x7d   : >> { %s2925_s4 = sld [smem:[#allocation2 + $0xe]]  ;;  %v969_v22 = vstv %s1994_s25 }
  0x7e   : >> { %s2929_s1 = sld [smem:[#allocation2 + $0x14]]  ;;  %v958_v24 = vsub.f32 %v957_v14, %v954_v3  ;;  %v970_v25 = vmin.f32 %v969_v22, %v968_v10  ;;  %v981_v27 = vmax.f32 %v969_v22, %v2731_v12  ;;  %v855_v28 = vmax.f32 %v854_v17, 0.0 }
  0x7f   : >> { %s2937_s15 = sld [smem:[#allocation2 + $0x12]]  ;;  %v973_v30 = vstv %s2905_s17  ;;  %v977_v32 = vstv %s2911_s30 }
  0x80   : >> { %s2942_s12 = sld [smem:[#allocation2 + $0x13]]  ;;  %v961_v33 = vmul.f32 %v960_v18, %v958_v24  ;;  %v965_v34 = vmul.f32 %v964_v21, %v958_v24  ;;  %v971_v35 = vsub.f32 %v970_v25, %v956_v5  ;;  %v982_v36 = vstv %s2914_s16 }
  0x81   : >> { %s2933_s11 = scalar_lea.vmem %s3521_s0, %s2674_s20  ;;  %s2003_s22 = sld [smem:[#allocation2 + $0x19]]  ;;  %v983_v19 = vmin.f32 %v982_v36, %v981_v27  ;;  %v994_v38 = vmax.f32 %v982_v36, %v2731_v12 }
  0x82   : >> { %1968 = vst [vmem:[%s2933_s11 + $0x38] sm:$0xff] %v855_v28  ;;  %v986_v37 = vstv %s2922_s13  ;;  %s2951_s14 = sld [smem:[#allocation2 + $0x17]]  ;;  %v962_v39 = vadd.f32 %v961_v33, %v949_v23  ;;  %v966_v40 = vadd.f32 %v965_v34, %v951_v29  ;;  %v974_v41 = vmul.f32 %v973_v30, %v971_v35 }
  0x83   : >> { %v978_v31 = vmul.f32 %v977_v32, %v971_v35  ;;  %s2953_s9 = sld [smem:[#allocation2 + $0x18]]  ;;  %v984_v45 = vsub.f32 %v983_v19, %v969_v22  ;;  %v990_v46 = vstv %s2925_s4  ;;  %v940_v35 = vmul.f32 %v2879_v48, %v804_v13 }
  0x84   : >> { %v995_v47 = vstv %s2929_s1  ;;  %s2006_s23 = sld [smem:[#allocation2 + $0x1e]]  ;;  %v975_v42 = vadd.f32 %v974_v41, %v962_v39  ;;  %v939_v19 = vmul.f32 %v933_v7, %v2799_v55 }
  0x85   : >> { %v979_v49 = vadd.f32 %v978_v31, %v966_v40  ;;  %v996_v50 = vmin.f32 %v995_v47, %v994_v38  ;;  %v999_v52 = vstv %s2937_s15  ;;  %s2959_s18 = sld [smem:[#allocation2 + $0x1c]]  ;;  %v987_v53 = vmul.f32 %v986_v37, %v984_v45 }
  0x86   : >> { %v991_v54 = vmul.f32 %v990_v46, %v984_v45  ;;  %v1003_v0 = vstv %s2942_s12  ;;  %v1007_v1 = vmax.f32 %v995_v47, %v2731_v12  ;;  %s2963_s10 = sld [smem:[#allocation2 + $0x1d]]  ;;  %v945_v37 = vadd.f32 %v933_v7, %v804_v13 }
  0x87   : >> { %v997_v59 = vsub.f32 %v996_v50, %v982_v36  ;;  %v1008_v61 = vstv %s2003_s22  ;;  %s2966_s8 = sld [smem:[#allocation2 + $0x23]]  ;;  %v988_v62 = vadd.f32 %v987_v53, %v975_v42  ;;  %v875_v40 = vstv %s2807_s19 }
  0x88   : >> { %v992_v63 = vadd.f32 %v991_v54, %v979_v49  ;;  %v1009_v2 = vmin.f32 %v1008_v61, %v1007_v1  ;;  %v1012_v3 = vstv %s2951_s14  ;;  %s2969_s28 = sld [smem:[#allocation2 + $0x21]]  ;;  %v1020_v11 = vmax.f32 %v1008_v61, %v2731_v12 }
  0x89   : >> { %v1000_v4 = vmul.f32 %v999_v52, %v997_v59  ;;  %v1004_v5 = vmul.f32 %v1003_v0, %v997_v59  ;;  %v1016_v10 = vstv %s2953_s9  ;;  %s2973_s26 = sld [smem:[#allocation2 + $0x22]]  ;;  %v876_v42 = vmul.f32 %v875_v40, %v2837_v8 }
  0x8a   : >> { %v1010_v15 = vsub.f32 %v1009_v2, %v995_v47  ;;  %v1021_v16 = vstv %s2006_s23  ;;  %s2979_s29 = sld [smem:[#allocation2 + $0x3d]]  ;;  %v941_v49 = vadd.f32 %v940_v35, %v939_v19  ;;  %v946_v50 = vmul.f32 0.5, %v945_v37 }
  0x8b   : >> { %v1001_v14 = vadd.f32 %v1000_v4, %v988_v62  ;;  %v1005_v17 = vadd.f32 %v1004_v5, %v992_v63  ;;  %v1022_v18 = vmin.f32 %v1021_v16, %v1020_v11  ;;  %v1025_v21 = vstv %s2959_s18  ;;  %s2982_s25 = sld [smem:[#allocation2 + $0x3e]] }
  0x8c   : >> { %v1013_v22 = vmul.f32 %v1012_v3, %v1010_v15  ;;  %v1017_v23 = vmul.f32 %v1016_v10, %v1010_v15  ;;  %v1029_v24 = vstv %s2963_s10  ;;  %v1033_v6 = vmax.f32 %v1021_v16, %v2731_v12  ;;  %s2986_s17 = sld [smem:[#allocation2 + $0x3c]] }
  0x8d   : >> { %v1023_v9 = vsub.f32 %v1022_v18, %v1008_v61  ;;  %v1034_v25 = vstv %s2966_s8  ;;  %s2016_s30 = sld [smem:[#allocation2 + $0x41]] }
  0x8e   : >> { %v1014_v27 = vadd.f32 %v1013_v22, %v1001_v14  ;;  %v1018_v28 = vadd.f32 %v1017_v23, %v1005_v17  ;;  %v1035_v29 = vmin.f32 %v1034_v25, %v1033_v6  ;;  %s2989_s16 = sld [smem:[#allocation2 + $0x3f]]  ;;  %v1038_v33 = vstv %s2969_s28 }
  0x8f   : >> { %v1026_v30 = vmul.f32 %v1025_v21, %v1023_v9  ;;  %v1030_v32 = vmul.f32 %v1029_v24, %v1023_v9  ;;  %v1042_v34 = vstv %s2973_s26  ;;  %s2993_s0 = sld [smem:[#allocation2 + $0x40]]  ;;  %v944_v22 = vmul.f32 %v2268_v56, %v941_v49 }
  0x90   : >> { %v1036_v36 = vsub.f32 %v1035_v29, %v1021_v16  ;;  %s2019_s13 = sld [smem:[#allocation2 + $0x46]]  ;;  %v1055_v58 = vstv %s2979_s29 }
  0x91   : >> { %v1027_v38 = vadd.f32 %v1026_v30, %v1014_v27  ;;  %v1031_v39 = vadd.f32 %v1030_v32, %v1018_v28  ;;  %s2997_s4 = sld [smem:[#allocation2 + $0x44]]  ;;  %v1057_v63 = vstv %s2982_s25  ;;  %v947_v19 = vsel %vm938_vm1, %v944_v22, %v946_v50 }
  0x92   : >> { %v1039_v41 = vmul.f32 %v1038_v33, %v1036_v36  ;;  %v1043_v31 = vmul.f32 %v1042_v34, %v1036_v36  ;;  %v1060_v44 = vstv %s2986_s17  ;;  %s3001_s1 = sld [smem:[#allocation2 + $0x45]]  ;;  %v864_v33 = vstv %s2792_s2 }
  0x93   : >> { %v1061_v45 = vmax.f32 %v1060_v44, %v2731_v12  ;;  %v1062_v48 = vstv %s2016_s30  ;;  %s2022_s15 = sld [smem:[#allocation2 + $0x4b]]  ;;  %v888_v34 = vstv %s2820_s27  ;;  %v1045_v49 = vmul.f32 %v947_v19, %v2890_v43 }
  0x94   : >> { %v1040_v46 = vadd.f32 %v1039_v41, %v1027_v38  ;;  %v1044_v55 = vadd.f32 %v1043_v31, %v1031_v39  ;;  %v1074_v47 = vmax.f32 %v1062_v48, %v2731_v12  ;;  %s3005_s12 = sld [smem:[#allocation2 + $0x49]]  ;;  %v1066_v54 = vstv %s2989_s16 }
  0x95   : >> { %v1063_v52 = vmin.f32 %v1062_v48, %v1061_v45  ;;  %s3009_s19 = sld [smem:[#allocation2 + $0x4a]]  ;;  %v1070_v0 = vstv %s2993_s0  ;;  %v877_v45 = vadd.f32 %v876_v42, %v864_v33 }
  0x96   : >> { %v1046_v53 = vmul.f32 %v1044_v55, %v1040_v46  ;;  %v1075_v1 = vstv %s2019_s13  ;;  %s3013_s22 = sld [smem:[#allocation2 + $0x50]]  ;;  %v901_v46 = vstv %s2840_s21 }
  0x97   : >> { %v1064_v59 = vsub.f32 %v1063_v52, %v1060_v44  ;;  %v1076_v8 = vmin.f32 %v1075_v1, %v1074_v47  ;;  %v1087_v61 = vmax.f32 %v1075_v1, %v2731_v12  ;;  %s3017_s14 = sld [smem:[#allocation2 + $0x4e]]  ;;  %v1079_v2 = vstv %s2997_s4 }
  0x98   : >> { %v1047_v62 = vmax.f32 %v1046_v53, 1e-12  ;;  %v1083_v3 = vstv %s3001_s1  ;;  %s3022_s9 = sld [smem:[#allocation2 + $0x4f]]  ;;  %v902_v53 = vmul.f32 %v901_v46, %v2884_v51 }
  0x99   : >> { %v1067_v4 = vmul.f32 %v1066_v54, %v1064_v59  ;;  %v1071_v5 = vmul.f32 %v1070_v0, %v1064_v59  ;;  %v1077_v10 = vsub.f32 %v1076_v8, %v1062_v48  ;;  %v1088_v11 = vstv %s2022_s15  ;;  %s3024_s23 = sld [smem:[#allocation2 + $0x55]] }
  0x9a   : >> { %2269 = vrcp.f32 %v1047_v62  ;;  %v1089_v13 = vmin.f32 %v1088_v11, %v1087_v61  ;;  %v1092_v15 = vstv %s3005_s12  ;;  %v1100_v16 = vmax.f32 %v1088_v11, %v2731_v12  ;;  %s3028_s18 = sld [smem:[#allocation2 + $0x53]] }
  0x9b   : >> { %v1068_v14 = vadd.f32 %v1067_v4, %v1055_v58  ;;  %v1072_v17 = vadd.f32 %v1071_v5, %v1057_v63  ;;  %v1080_v18 = vmul.f32 %v1079_v2, %v1077_v10  ;;  %v1084_v21 = vmul.f32 %v1083_v3, %v1077_v10  ;;  %s3030_s10 = sld [smem:[#allocation2 + $0x54]] }
  0x9c   : >> { %v1090_v23 = vsub.f32 %v1089_v13, %v1075_v1  ;;  %v1096_v24 = vstv %s3009_s19  ;;  %v1101_v6 = vstv %s3013_s22  ;;  %s1983_s8 = sld [smem:[#allocation2 + $0x8a]]  ;;  %v889_v48 = vmul.f32 %v888_v34, %v2860_v20 }
  0x9d   : >> { %v1081_v7 = vadd.f32 %v1080_v18, %v1068_v14  ;;  %v1085_v9 = vadd.f32 %v1084_v21, %v1072_v17  ;;  %v1102_v25 = vmin.f32 %v1101_v6, %v1100_v16  ;;  %v1105_v27 = vstv %s3017_s14  ;;  %s1986_s2 = sld [smem:[#allocation2 + $0x8f]] }
  0x9e   : >> { %v1093_v28 = vmul.f32 %v1092_v15, %v1090_v23  ;;  %v1097_v29 = vmul.f32 %v1096_v24, %v1090_v23  ;;  %v1109_v30 = vstv %s3022_s9  ;;  %v1113_v32 = vmax.f32 %v1101_v6, %v2731_v12  ;;  %s3522_s28 = sld [smem:[#allocation23_spill]] }
  0x9f   : >> { %v1103_v35 = vsub.f32 %v1102_v25, %v1088_v11  ;;  %v1114_v36 = vstv %s3024_s23  ;;  %v890_v52 = vadd.f32 %v889_v48, %v877_v45  ;;  %s3524_s25 = sld [smem:[#allocation17_spill]] }
  0xa0   : >> { %v1094_v37 = vadd.f32 %v1093_v28, %v1081_v7  ;;  %v1098_v38 = vadd.f32 %v1097_v29, %v1085_v9  ;;  %v1115_v39 = vmin.f32 %v1114_v36, %v1113_v32  ;;  %v1118_v31 = vstv %s3028_s18 }
  0xa1   : >> { %v1106_v40 = vmul.f32 %v1105_v27, %v1103_v35  ;;  %v1110_v41 = vmul.f32 %v1109_v30, %v1103_v35  ;;  %v1122_v44 = vstv %s3030_s10  ;;  %v903_v58 = vadd.f32 %v902_v53, %v890_v52 }
  0xa2   : >> { %v1116_v12 = vsub.f32 %v1115_v39, %v1101_v6  ;;  %v914_v1 = vstv %s1983_s8 }
  0xa3   : >> { %v1107_v55 = vadd.f32 %v1106_v40, %v1094_v37  ;;  %v1111_v47 = vadd.f32 %v1110_v41, %v1098_v38  ;;  %v915_v59 = vmul.f32 %v914_v1, %v2901_v60  ;;  %v927_v62 = vstv %s1986_s2 }
  0xa4   : >> { %v1119_v57 = vmul.f32 %v1118_v31, %v1116_v12  ;;  %v1123_v50 = vmul.f32 %v1122_v44, %v1116_v12  ;;  %v928_v51 = vmul.f32 %v927_v62, %v2947_v26  ;;  %s3523_s26 = scalar_lea.vmem %s3522_s28, %s2628_s24 }
  0xa5   : >> { %v916_v63 = vadd.f32 %v915_v59, %v903_v58  ;;  %s1131_s29 = scalar_lea.vmem %s3523_s26, %s2674_s20  ;;  %s710_s0 = sadd.s32 1, %s3524_s25  }
  0xa6   : >> { %v1120_v54 = vadd.f32 %v1119_v57, %v1107_v55  ;;  %v1124_v0 = vadd.f32 %v1123_v50, %v1111_v47  ;;  %v1132_v3 = vld [vmem:[%s1131_s29] sm:$0xff]  ;;  %p707_p7 = scmp.ge.s32.totalorder %s710_s0, 7  }
  0xa7   : >> { %v2270_v42 = vpop.eup %2269  ;;  %v929_v2 = vadd.f32 %v928_v51, %v916_v63 }
  0xa8   : >> { %v1049_v20 = vmul.f32 %v2270_v42, %v1045_v49  ;;  %v1126_v56 = vmul.f32 %v1124_v0, %v1120_v54 }
  0xa9   : >> { %v1125_v4 = vmul.f32 %v929_v2, %v2890_v43 }
  0xaa   : >> { %v1050_v8 = vmax.f32 %v1049_v20, 0.0  ;;  %v1127_v61 = vmax.f32 %v1126_v56, 1e-12  ;;  %v1133_v5 = vmul.f32 %v1132_v3, %v1049_v20 }
  0xac   : >> { %1053 = vst [vmem:[%s2933_s11] sm:$0xff] %v1050_v8  ;;  %2271 = vrcp.f32 %v1127_v61 }
  0xb9   : >> { %v2272_v60 = vpop.eup %2271 }
  0xba   : >> { %v1129_v10 = vmul.f32 %v2272_v60, %v1125_v4 }
  0xbc   : >> { %v1134_v11 = vadd.f32 %v1133_v5, %v1129_v10  ;;  %709 = sbr.rel (!%p707_p7) target bundleno = 58 (0x3a), region = 206 }
  0xbe   : >> { %v1135_v13 = vmax.f32 %v1134_v11, 0.0 }
  0xc0   : >> { %2033 = vst [vmem:[%s2933_s11 + $0x70] sm:$0xff] %v1135_v13 }
  0xc1   : > { %1146 = sbr.rel (!%p2587_p5) target bundleno = 380 (0x17c), region = 67  ;;  %s3526_s30 = sld [smem:[#allocation15_spill]] (%p2587_p5) }
  0xc2   : > { %s3527_s20 = sld [smem:[#allocation7_spill]] (%p2587_p5) }
  0xc3   : > { %s3528_s12 = sld [smem:[#allocation24_spill]] (%p2587_p5) }
  0xc7   : > { %s1148_s16 = ssub.s32 8, %s3526_s30 }
  0xc8   : > { %s2035_s13 = sshll.u32 %s3527_s20, 3  ;;  %p1149_p8 = scmp.lt.s32.totalorder %s1148_s16, 7 }
  0xc9   : > { %s1154_s4 = sadd.s32 %s2035_s13, %s3526_s30 }
  0xca   : > { %s2036_s1 = sshll.u32 %s1154_s4, 3  ;;  %s3563_s16 = smov (!%p1149_p8, %s1148_s16), 7 }
  0xcb   : > { %s3070_s19 = scalar_lea.vmem %s3528_s12, %s2036_s1   ;;  %s1151_s22 = smul.u32 384, %s3563_s16 }
  0xcc   : > { %s3072_s0 = sshll.u32 %s3563_s16, 3 }
  0xcd   : > { %p2038_p11 = scmp.eq.s32.totalorder %s1151_s22, 0 }
  0xce   : > { %p1161_p5 = scmp.lt.u32.totalorder (!%p2038_p11), %s3072_s0, 8 }
  0xcf   : > { %1160 = sbr.rel (%p2038_p11) target bundleno = 380 (0x17c), region = 71 }
  0xd4   : > { %1164 = sbr.rel (%p1161_p5) target bundleno = 369 (0x171), region = 75  ;;  %s3076_s24 = sand.u32 (!%p1161_p5), 7, %s3072_s0  }
  0xd5   : > { %p1185_p12 = scmp.eq.s32.totalorder (!%p1161_p5), %s3076_s24, 0  ;;  %p2039_p13 = scmp.ne.s32.totalorder (!%p1161_p5), %s3076_s24, 0 }
  0xd9   : > { %1188 = sbr.rel (%p2039_p13) target bundleno = 289 (0x121), region = 90  ;;  %s1189_s14 = sshrl.u32 (!%p2039_p13), %s3072_s0, 3 }
  0xda   : > { %2273 = sdivrem.u32 (!%p2039_p13), %s1189_s14, 24 }
  0xe3   : > { %s3083_s9 = spop.drf %2273 }
  0xe4   : > { %p2040_p0 = scmp.le.s32.totalorder %s3083_s9, 0 }
  0xe5   : > { %s3529_s23 = sld [smem:[#allocation16_spill]] (!%p2040_p0)  ;;  %s3530_s18 = smov (!%p2040_p0), %s3070_s19 }
  0xe6   : > { %1782 = sbr.rel (%p2040_p0) target bundleno = 264 (0x108), region = 211  ;;  %s3092_s10 = smov (!%p2040_p0), 0  }
  0xe7   : > { %s3094_s8 = smov (!%p2040_p0), 0  }
  0xeb LB: >> { %v1203_v43 = vld [vmem:[%s2434_s23] sm:$0xff]  ;;  %v1205_v26 = vld [vmem:[%s2434_s23 + $0x8] sm:$0xff]  ;;  %v1207_v15 = vld [vmem:[%s2434_s23 + $0x10] sm:$0xff]  ;;  %s1347_s2 = sadd.s32 1, %s2438_s10  ;;  %s3532_s21 = sld [smem:[#allocation16_spill]]  ;;  %s2442_s8 = sphi %s3094_s8, %s1197_s8   ;;  %s2438_s10 = sphi %s3092_s10, %s3535_s10   ;;  %s2434_s23 = sphi %s3529_s23, %s3534_s23   ;;  %s2430_s18 = sphi %s3530_s18, %s3533_s18  }
  0xec   : >> { %1204 = vst [vmem:[%s2430_s18] sm:$0xff] %v1203_v43  ;;  %1206 = vst [vmem:[%s2430_s18 + $0x8] sm:$0xff] %v1205_v26  ;;  %v1209_v16 = vld [vmem:[%s2434_s23 + $0x18] sm:$0xff]  ;;  %v1211_v14 = vld [vmem:[%s2434_s23 + $0x20] sm:$0xff]  ;;  %p3133_p1 = scmp.ge.s32.totalorder %s1347_s2, %s3083_s9  ;;  %s1197_s8 = sadd.s32 1, %s2442_s8  }
  0xed   : >> { %1208 = vst [vmem:[%s2430_s18 + $0x10] sm:$0xff] %v1207_v15  ;;  %v1213_v17 = vld [vmem:[%s2434_s23 + $0x28] sm:$0xff]  ;;  %1210 = vst [vmem:[%s2430_s18 + $0x18] sm:$0xff] %v1209_v16  ;;  %v1215_v18 = vld [vmem:[%s2434_s23 + $0x30] sm:$0xff]  ;;  %p1196_p2 = scmp.ge.s32.totalorder %s1197_s8, %s3083_s9 }
  0xee   : >> { %1212 = vst [vmem:[%s2430_s18 + $0x20] sm:$0xff] %v1211_v14  ;;  %1214 = vst [vmem:[%s2430_s18 + $0x28] sm:$0xff] %v1213_v17  ;;  %v1217_v21 = vld [vmem:[%s2434_s23 + $0x38] sm:$0xff]  ;;  %v1219_v22 = vld [vmem:[%s2434_s23 + $0x40] sm:$0xff]  ;;  %s3565_s2 = smov (%p3133_p1, %s1347_s2), 0 }
  0xef   : >> { %1216 = vst [vmem:[%s2430_s18 + $0x30] sm:$0xff] %v1215_v18  ;;  %1218 = vst [vmem:[%s2430_s18 + $0x38] sm:$0xff] %v1217_v21  ;;  %v1221_v23 = vld [vmem:[%s2434_s23 + $0x48] sm:$0xff]  ;;  %v1223_v24 = vld [vmem:[%s2434_s23 + $0x50] sm:$0xff]  ;;  %s1350_s28 = smul.u32 192, %s3565_s2  ;;  %s3535_s10 = smov %s3565_s2 }
  0xf0   : >> { %1220 = vst [vmem:[%s2430_s18 + $0x40] sm:$0xff] %v1219_v22  ;;  %v1225_v6 = vld [vmem:[%s2434_s23 + $0x58] sm:$0xff]  ;;  %1252 = vst [vmem:[%s2430_s18 + $0x80] sm:$0xff] %v1217_v21  ;;  %v1227_v7 = vld [vmem:[%s2434_s23 + $0x60] sm:$0xff] }
  0xf1   : >> { %1254 = vst [vmem:[%s2430_s18 + $0x88] sm:$0xff] %v1219_v22  ;;  %1222 = vst [vmem:[%s2430_s18 + $0x48] sm:$0xff] %v1221_v23  ;;  %v1229_v9 = vld [vmem:[%s2434_s23 + $0x68] sm:$0xff]  ;;  %v1231_v25 = vld [vmem:[%s2434_s23 + $0x70] sm:$0xff]  ;;  %s1352_s26 = scalar_lea.vmem %s3532_s21, %s1350_s28   ;;  %s1353_s29 = scalar_lea.vmem %s3070_s19, %s1350_s28  }
  0xf2   : >> { %1224 = vst [vmem:[%s2430_s18 + $0x50] sm:$0xff] %v1223_v24  ;;  %1226 = vst [vmem:[%s2430_s18 + $0x58] sm:$0xff] %v1225_v6  ;;  %v1233_v27 = vld [vmem:[%s2434_s23 + $0x78] sm:$0xff]  ;;  %v1269_v28 = vld [vmem:[%s2434_s23 + $0x80] sm:$0xff] }
  0xf3   : >> { %1256 = vst [vmem:[%s2430_s18 + $0x90] sm:$0xff] %v1221_v23  ;;  %1258 = vst [vmem:[%s2430_s18 + $0x98] sm:$0xff] %v1223_v24  ;;  %v1271_v29 = vld [vmem:[%s2434_s23 + $0x88] sm:$0xff]  ;;  %v1273_v30 = vld [vmem:[%s2434_s23 + $0x90] sm:$0xff] }
  0xf4   : >> { %1260 = vst [vmem:[%s2430_s18 + $0xa0] sm:$0xff] %v1225_v6  ;;  %1228 = vst [vmem:[%s2430_s18 + $0x60] sm:$0xff] %v1227_v7  ;;  %v1275_v32 = vld [vmem:[%s2434_s23 + $0x98] sm:$0xff]  ;;  %v1277_v33 = vld [vmem:[%s2434_s23 + $0xa0] sm:$0xff] }
  0xf5   : >> { %1230 = vst [vmem:[%s2430_s18 + $0x68] sm:$0xff] %v1229_v9  ;;  %1232 = vst [vmem:[%s2430_s18 + $0x70] sm:$0xff] %v1231_v25  ;;  %v1279_v34 = vld [vmem:[%s2434_s23 + $0xa8] sm:$0xff]  ;;  %v1281_v35 = vld [vmem:[%s2434_s23 + $0xb0] sm:$0xff] }
  0xf6   : >> { %1262 = vst [vmem:[%s2430_s18 + $0xa8] sm:$0xff] %v1227_v7  ;;  %1264 = vst [vmem:[%s2430_s18 + $0xb0] sm:$0xff] %v1229_v9  ;;  %v1317_v36 = vld [vmem:[%s2434_s23 + $0xb8] sm:$0xff]  ;;  %v1319_v19 = vld [vmem:[%s2434_s23 + $0xc0] sm:$0xff] }
  0xf7   : >> { %1266 = vst [vmem:[%s2430_s18 + $0xb8] sm:$0xff] %v1231_v25  ;;  %1300 = vst [vmem:[%s2430_s18 + $0x100] sm:$0xff] %v1231_v25  ;;  %v1321_v37 = vld [vmem:[%s2434_s23 + $0xc8] sm:$0xff]  ;;  %v1323_v38 = vld [vmem:[%s2434_s23 + $0xd0] sm:$0xff] }
  0xf8   : >> { %1234 = vst [vmem:[%s2430_s18 + $0x78] sm:$0xff] %v1233_v27  ;;  %1268 = vst [vmem:[%s2430_s18 + $0xc0] sm:$0xff] %v1233_v27  ;;  %v1325_v39 = vld [vmem:[%s2434_s23 + $0xd8] sm:$0xff]  ;;  %v1327_v40 = vld [vmem:[%s2434_s23 + $0xe0] sm:$0xff] }
  0xf9   : >> { %1270 = vst [vmem:[%s2430_s18 + $0xc8] sm:$0xff] %v1269_v28  ;;  %1272 = vst [vmem:[%s2430_s18 + $0xd0] sm:$0xff] %v1271_v29  ;;  %v1329_v41 = vld [vmem:[%s2434_s23 + $0xe8] sm:$0xff]  ;;  %v1331_v31 = vld [vmem:[%s2434_s23 + $0xf0] sm:$0xff] }
  0xfa   : >> { %1302 = vst [vmem:[%s2430_s18 + $0x108] sm:$0xff] %v1233_v27  ;;  %1304 = vst [vmem:[%s2430_s18 + $0x110] sm:$0xff] %v1269_v28  ;;  %v1333_v44 = vld [vmem:[%s2434_s23 + $0xf8] sm:$0xff]  ;;  %v1335_v45 = vld [vmem:[%s2434_s23 + $0x100] sm:$0xff] }
  0xfb   : >> { %1306 = vst [vmem:[%s2430_s18 + $0x118] sm:$0xff] %v1271_v29  ;;  %1274 = vst [vmem:[%s2430_s18 + $0xd8] sm:$0xff] %v1273_v30  ;;  %v1337_v48 = vld [vmem:[%s2434_s23 + $0x108] sm:$0xff]  ;;  %v1339_v12 = vld [vmem:[%s2434_s23 + $0x110] sm:$0xff] }
  0xfc   : >> { %1276 = vst [vmem:[%s2430_s18 + $0xe0] sm:$0xff] %v1275_v32  ;;  %1278 = vst [vmem:[%s2430_s18 + $0xe8] sm:$0xff] %v1277_v33  ;;  %v1341_v46 = vld [vmem:[%s2434_s23 + $0x118] sm:$0xff]  ;;  %v1343_v55 = vld [vmem:[%s2434_s23 + $0x120] sm:$0xff] }
  0xfd   : >> { %1308 = vst [vmem:[%s2430_s18 + $0x120] sm:$0xff] %v1273_v30  ;;  %1310 = vst [vmem:[%s2430_s18 + $0x128] sm:$0xff] %v1275_v32  ;;  %v1345_v47 = vld [vmem:[%s2434_s23 + $0x128] sm:$0xff]  ;;  %s3534_s23 = smov %s1352_s26 }
  0xfe   : >> { %1312 = vst [vmem:[%s2430_s18 + $0x130] sm:$0xff] %v1277_v33  ;;  %1280 = vst [vmem:[%s2430_s18 + $0xf0] sm:$0xff] %v1279_v34 }
  0xff   : >> { %1282 = vst [vmem:[%s2430_s18 + $0xf8] sm:$0xff] %v1281_v35  ;;  %1314 = vst [vmem:[%s2430_s18 + $0x138] sm:$0xff] %v1279_v34 }
 0x100   : >> { %1316 = vst [vmem:[%s2430_s18 + $0x140] sm:$0xff] %v1281_v35  ;;  %1318 = vst [vmem:[%s2430_s18 + $0x148] sm:$0xff] %v1317_v36 }
 0x101   : >> { %1320 = vst [vmem:[%s2430_s18 + $0x150] sm:$0xff] %v1319_v19  ;;  %1322 = vst [vmem:[%s2430_s18 + $0x158] sm:$0xff] %v1321_v37 }
 0x102   : >> { %1324 = vst [vmem:[%s2430_s18 + $0x160] sm:$0xff] %v1323_v38  ;;  %1326 = vst [vmem:[%s2430_s18 + $0x168] sm:$0xff] %v1325_v39 }
 0x103   : >> { %1328 = vst [vmem:[%s2430_s18 + $0x170] sm:$0xff] %v1327_v40  ;;  %1330 = vst [vmem:[%s2430_s18 + $0x178] sm:$0xff] %v1329_v41  ;;  %1199 = sbr.rel (!%p1196_p2) target bundleno = 235 (0xeb), region = 217 }
 0x104   : >> { %1332 = vst [vmem:[%s2430_s18 + $0x180] sm:$0xff] %v1331_v31  ;;  %1334 = vst [vmem:[%s2430_s18 + $0x188] sm:$0xff] %v1333_v44 }
 0x105   : >> { %1336 = vst [vmem:[%s2430_s18 + $0x190] sm:$0xff] %v1335_v45  ;;  %1338 = vst [vmem:[%s2430_s18 + $0x198] sm:$0xff] %v1337_v48 }
 0x106   : >> { %1340 = vst [vmem:[%s2430_s18 + $0x1a0] sm:$0xff] %v1339_v12  ;;  %1342 = vst [vmem:[%s2430_s18 + $0x1a8] sm:$0xff] %v1341_v46 }
 0x107   : >> { %1344 = vst [vmem:[%s2430_s18 + $0x1b0] sm:$0xff] %v1343_v55  ;;  %1346 = vst [vmem:[%s2430_s18 + $0x1b8] sm:$0xff] %v1345_v47  ;;  %s3533_s18 = smov %s1353_s29 }
 0x108 PF: > { %s3536_s25 = sld [smem:[#allocation16_spill]]  ;;  %2275 = sdivrem.u32 %s1189_s14, 24 }
 0x109   : > { %s2041_s17 = smul.u32 3072, %s3083_s9 }
 0x10b   : > { %s1358_s30 = sshra.s32 %s2041_s17, 4 }
 0x10c   : > { %s3233_s16 = scalar_lea.vmem %s3070_s19, %s1358_s30  }
 0x10e   : > { %s3230_s20 = scalar_lea.vmem %s3536_s25, %s1358_s30  }
 0x111   : > { %s3235_s13 = spop.drf %2275 }
 0x112   : > { %p2043_p3 = scmp.le.s32.totalorder %s3235_s13, 0 }
 0x113   : > { %s3537_s4 = smov (!%p2043_p3), %s3233_s16  ;;  %s2448_s1 = smov (!%p2043_p3), %s3230_s20  }
 0x114   : > { %1796 = sbr.rel (%p2043_p3) target bundleno = 289 (0x121), region = 222  ;;  %s2452_s15 = smov (!%p2043_p3), 0  }
 0x115   : > { %s2456_s11 = smov (!%p2043_p3), 0  }
 0x119 LB: >> { %v1374_v49 = vld [vmem:[%s2450_s1] sm:$0xff]  ;;  %v1376_v57 = vld [vmem:[%s2450_s1 + $0x38] sm:$0xff]  ;;  %v1378_v50 = vld [vmem:[%s2450_s1 + $0x70] sm:$0xff]  ;;  %s1380_s12 = sadd.s32 1, %s2454_s15  ;;  %s1368_s11 = sadd.s32 1, %s2458_s11   ;;  %s2458_s11 = sphi %s2456_s11, %s1368_s11   ;;  %s2454_s15 = sphi %s2452_s15, %s2453_s15   ;;  %s2450_s1 = sphi %s2448_s1, %s1385_s1   ;;  %s2446_s4 = sphi %s3537_s4, %s1386_s4  }
 0x11a   : >> { %1375 = vst [vmem:[%s2446_s4] sm:$0xff] %v1374_v49  ;;  %1377 = vst [vmem:[%s2446_s4 + $0x80] sm:$0xff] %v1376_v57  ;;  %p1381_p4 = scmp.ge.s32.totalorder %s1380_s12, %s3235_s13  ;;  %p1367_p6 = scmp.ge.s32.totalorder %s1368_s11, %s3235_s13 }
 0x11b   : >> { %1379 = vst [vmem:[%s2446_s4 + $0x100] sm:$0xff] %v1378_v50 }
 0x11c   : >> { %s3567_s12 = smov (%p1381_p4, %s1380_s12), 0  ;;  %1370 = sbr.rel (!%p1367_p6) target bundleno = 281 (0x119), region = 228 }
 0x11d   : >> { %s2044_s22 = sshll.u32 %s3567_s12, 3  ;;  %s2453_s15 = smov %s3567_s12  }
 0x11e   : >> { %s1385_s1 = scalar_lea.vmem %s3230_s20, %s2044_s22   ;;  %s1386_s4 = scalar_lea.vmem %s3233_s16, %s2044_s22  }
 0x121 PF: > { %1389 = sbr.rel (%p1185_p12) target bundleno = 369 (0x171), region = 108  ;;  %s3538_s14 = sld [smem:[#allocation16_spill]] (!%p1185_p12) }
 0x122   : > { %s1391_s9 = ssub.s32 (!%p1185_p12), %s3072_s0, %s3076_s24  ;;  %s1395_s23 = sshrl.u32 (!%p1185_p12), %s3072_s0, 3 }
 0x123   : > { %s3258_s10 = scalar_lea.vmem (!%p1185_p12), %s3070_s19, %s1391_s9  ;;  %2277 = sdivrem.u32 (!%p1185_p12), %s1395_s23, 24 }
 0x127   : > { %s3255_s18 = scalar_lea.vmem %s3538_s14, %s1391_s9 }
 0x12c   : > { %s3262_s8 = spop.drf %2277 }
 0x12d   : > { %p2046_p9 = scmp.le.s32.totalorder %s3262_s8, 0 }
 0x12e   : > { %s3539_s2 = sld [smem:[#allocation16_spill]] (!%p2046_p9)  ;;  %s3540_s27 = smov (!%p2046_p9), %s3070_s19 }
 0x12f   : > { %1810 = sbr.rel (%p2046_p9) target bundleno = 337 (0x151), region = 233  ;;  %s3271_s21 = smov (!%p2046_p9), 0  }
 0x130   : > { %s3273_s28 = smov (!%p2046_p9), 0  }
 0x134 LB: >> { %v1409_v52 = vld [vmem:[%s2466_s2] sm:$0xff]  ;;  %v1411_v53 = vld [vmem:[%s2466_s2 + $0x8] sm:$0xff]  ;;  %v1413_v54 = vld [vmem:[%s2466_s2 + $0x10] sm:$0xff]  ;;  %s1553_s26 = sadd.s32 1, %s2470_s21  ;;  %s3542_s25 = sld [smem:[#allocation16_spill]]  ;;  %s2474_s28 = sphi %s3273_s28, %s1403_s28   ;;  %s2470_s21 = sphi %s3271_s21, %s3545_s21   ;;  %s2466_s2 = sphi %s3539_s2, %s3544_s2   ;;  %s2462_s27 = sphi %s3540_s27, %s3543_s27  }
 0x135   : >> { %1410 = vst [vmem:[%s2462_s27] sm:$0xff] %v1409_v52  ;;  %1412 = vst [vmem:[%s2462_s27 + $0x8] sm:$0xff] %v1411_v53  ;;  %v1415_v0 = vld [vmem:[%s2466_s2 + $0x18] sm:$0xff]  ;;  %v1417_v42 = vld [vmem:[%s2466_s2 + $0x20] sm:$0xff]  ;;  %p3312_p10 = scmp.ge.s32.totalorder %s1553_s26, %s3262_s8  ;;  %s1403_s28 = sadd.s32 1, %s2474_s28  }
 0x136   : >> { %1414 = vst [vmem:[%s2462_s27 + $0x10] sm:$0xff] %v1413_v54  ;;  %v1419_v1 = vld [vmem:[%s2466_s2 + $0x28] sm:$0xff]  ;;  %1416 = vst [vmem:[%s2462_s27 + $0x18] sm:$0xff] %v1415_v0  ;;  %v1421_v20 = vld [vmem:[%s2466_s2 + $0x30] sm:$0xff]  ;;  %p1402_p7 = scmp.ge.s32.totalorder %s1403_s28, %s3262_s8 }
 0x137   : >> { %1418 = vst [vmem:[%s2462_s27 + $0x20] sm:$0xff] %v1417_v42  ;;  %1420 = vst [vmem:[%s2462_s27 + $0x28] sm:$0xff] %v1419_v1  ;;  %v1423_v56 = vld [vmem:[%s2466_s2 + $0x38] sm:$0xff]  ;;  %v1425_v58 = vld [vmem:[%s2466_s2 + $0x40] sm:$0xff]  ;;  %s3569_s26 = smov (%p3312_p10, %s1553_s26), 0 }
 0x138   : >> { %1422 = vst [vmem:[%s2462_s27 + $0x30] sm:$0xff] %v1421_v20  ;;  %1424 = vst [vmem:[%s2462_s27 + $0x38] sm:$0xff] %v1423_v56  ;;  %v1427_v59 = vld [vmem:[%s2466_s2 + $0x48] sm:$0xff]  ;;  %v1429_v8 = vld [vmem:[%s2466_s2 + $0x50] sm:$0xff]  ;;  %s1556_s17 = smul.u32 192, %s3569_s26  ;;  %s3545_s21 = smov %s3569_s26 }
 0x139   : >> { %1426 = vst [vmem:[%s2462_s27 + $0x40] sm:$0xff] %v1425_v58  ;;  %v1431_v61 = vld [vmem:[%s2466_s2 + $0x58] sm:$0xff]  ;;  %1458 = vst [vmem:[%s2462_s27 + $0x80] sm:$0xff] %v1423_v56  ;;  %v1433_v62 = vld [vmem:[%s2466_s2 + $0x60] sm:$0xff] }
 0x13a   : >> { %1460 = vst [vmem:[%s2462_s27 + $0x88] sm:$0xff] %v1425_v58  ;;  %1428 = vst [vmem:[%s2462_s27 + $0x48] sm:$0xff] %v1427_v59  ;;  %v1435_v63 = vld [vmem:[%s2466_s2 + $0x68] sm:$0xff]  ;;  %v1437_v51 = vld [vmem:[%s2466_s2 + $0x70] sm:$0xff]  ;;  %s1558_s30 = scalar_lea.vmem %s3542_s25, %s1556_s17   ;;  %s1559_s20 = scalar_lea.vmem %s3070_s19, %s1556_s17  }
 0x13b   : >> { %1430 = vst [vmem:[%s2462_s27 + $0x50] sm:$0xff] %v1429_v8  ;;  %1432 = vst [vmem:[%s2462_s27 + $0x58] sm:$0xff] %v1431_v61  ;;  %v1439_v2 = vld [vmem:[%s2466_s2 + $0x78] sm:$0xff]  ;;  %v1475_v3 = vld [vmem:[%s2466_s2 + $0x80] sm:$0xff] }
 0x13c   : >> { %1462 = vst [vmem:[%s2462_s27 + $0x90] sm:$0xff] %v1427_v59  ;;  %1464 = vst [vmem:[%s2462_s27 + $0x98] sm:$0xff] %v1429_v8  ;;  %v1477_v4 = vld [vmem:[%s2466_s2 + $0x88] sm:$0xff]  ;;  %v1479_v5 = vld [vmem:[%s2466_s2 + $0x90] sm:$0xff] }
 0x13d   : >> { %1466 = vst [vmem:[%s2462_s27 + $0xa0] sm:$0xff] %v1431_v61  ;;  %1434 = vst [vmem:[%s2462_s27 + $0x60] sm:$0xff] %v1433_v62  ;;  %v1481_v60 = vld [vmem:[%s2466_s2 + $0x98] sm:$0xff]  ;;  %v1483_v10 = vld [vmem:[%s2466_s2 + $0xa0] sm:$0xff] }
 0x13e   : >> { %1436 = vst [vmem:[%s2462_s27 + $0x68] sm:$0xff] %v1435_v63  ;;  %1438 = vst [vmem:[%s2462_s27 + $0x70] sm:$0xff] %v1437_v51  ;;  %v1485_v11 = vld [vmem:[%s2466_s2 + $0xa8] sm:$0xff]  ;;  %v1487_v13 = vld [vmem:[%s2466_s2 + $0xb0] sm:$0xff] }
 0x13f   : >> { %1468 = vst [vmem:[%s2462_s27 + $0xa8] sm:$0xff] %v1433_v62  ;;  %1470 = vst [vmem:[%s2462_s27 + $0xb0] sm:$0xff] %v1435_v63  ;;  %v1523_v43 = vld [vmem:[%s2466_s2 + $0xb8] sm:$0xff]  ;;  %v1525_v26 = vld [vmem:[%s2466_s2 + $0xc0] sm:$0xff] }
 0x140   : >> { %1472 = vst [vmem:[%s2462_s27 + $0xb8] sm:$0xff] %v1437_v51  ;;  %1506 = vst [vmem:[%s2462_s27 + $0x100] sm:$0xff] %v1437_v51  ;;  %v1527_v15 = vld [vmem:[%s2466_s2 + $0xc8] sm:$0xff]  ;;  %v1529_v16 = vld [vmem:[%s2466_s2 + $0xd0] sm:$0xff] }
 0x141   : >> { %1440 = vst [vmem:[%s2462_s27 + $0x78] sm:$0xff] %v1439_v2  ;;  %1474 = vst [vmem:[%s2462_s27 + $0xc0] sm:$0xff] %v1439_v2  ;;  %v1531_v14 = vld [vmem:[%s2466_s2 + $0xd8] sm:$0xff]  ;;  %v1533_v17 = vld [vmem:[%s2466_s2 + $0xe0] sm:$0xff] }
 0x142   : >> { %1476 = vst [vmem:[%s2462_s27 + $0xc8] sm:$0xff] %v1475_v3  ;;  %1478 = vst [vmem:[%s2462_s27 + $0xd0] sm:$0xff] %v1477_v4  ;;  %v1535_v18 = vld [vmem:[%s2466_s2 + $0xe8] sm:$0xff]  ;;  %v1537_v21 = vld [vmem:[%s2466_s2 + $0xf0] sm:$0xff] }
 0x143   : >> { %1508 = vst [vmem:[%s2462_s27 + $0x108] sm:$0xff] %v1439_v2  ;;  %1510 = vst [vmem:[%s2462_s27 + $0x110] sm:$0xff] %v1475_v3  ;;  %v1539_v22 = vld [vmem:[%s2466_s2 + $0xf8] sm:$0xff]  ;;  %v1541_v23 = vld [vmem:[%s2466_s2 + $0x100] sm:$0xff] }
 0x144   : >> { %1512 = vst [vmem:[%s2462_s27 + $0x118] sm:$0xff] %v1477_v4  ;;  %1480 = vst [vmem:[%s2462_s27 + $0xd8] sm:$0xff] %v1479_v5  ;;  %v1543_v24 = vld [vmem:[%s2466_s2 + $0x108] sm:$0xff]  ;;  %v1545_v6 = vld [vmem:[%s2466_s2 + $0x110] sm:$0xff] }
 0x145   : >> { %1482 = vst [vmem:[%s2462_s27 + $0xe0] sm:$0xff] %v1481_v60  ;;  %1484 = vst [vmem:[%s2462_s27 + $0xe8] sm:$0xff] %v1483_v10  ;;  %v1547_v7 = vld [vmem:[%s2466_s2 + $0x118] sm:$0xff]  ;;  %v1549_v9 = vld [vmem:[%s2466_s2 + $0x120] sm:$0xff] }
 0x146   : >> { %1514 = vst [vmem:[%s2462_s27 + $0x120] sm:$0xff] %v1479_v5  ;;  %1516 = vst [vmem:[%s2462_s27 + $0x128] sm:$0xff] %v1481_v60  ;;  %v1551_v25 = vld [vmem:[%s2466_s2 + $0x128] sm:$0xff]  ;;  %s3544_s2 = smov %s1558_s30 }
 0x147   : >> { %1518 = vst [vmem:[%s2462_s27 + $0x130] sm:$0xff] %v1483_v10  ;;  %1486 = vst [vmem:[%s2462_s27 + $0xf0] sm:$0xff] %v1485_v11 }
 0x148   : >> { %1488 = vst [vmem:[%s2462_s27 + $0xf8] sm:$0xff] %v1487_v13  ;;  %1520 = vst [vmem:[%s2462_s27 + $0x138] sm:$0xff] %v1485_v11 }
 0x149   : >> { %1522 = vst [vmem:[%s2462_s27 + $0x140] sm:$0xff] %v1487_v13  ;;  %1524 = vst [vmem:[%s2462_s27 + $0x148] sm:$0xff] %v1523_v43 }
 0x14a   : >> { %1526 = vst [vmem:[%s2462_s27 + $0x150] sm:$0xff] %v1525_v26  ;;  %1528 = vst [vmem:[%s2462_s27 + $0x158] sm:$0xff] %v1527_v15 }
 0x14b   : >> { %1530 = vst [vmem:[%s2462_s27 + $0x160] sm:$0xff] %v1529_v16  ;;  %1532 = vst [vmem:[%s2462_s27 + $0x168] sm:$0xff] %v1531_v14 }
 0x14c   : >> { %1534 = vst [vmem:[%s2462_s27 + $0x170] sm:$0xff] %v1533_v17  ;;  %1536 = vst [vmem:[%s2462_s27 + $0x178] sm:$0xff] %v1535_v18  ;;  %1405 = sbr.rel (!%p1402_p7) target bundleno = 308 (0x134), region = 239 }
 0x14d   : >> { %1538 = vst [vmem:[%s2462_s27 + $0x180] sm:$0xff] %v1537_v21  ;;  %1540 = vst [vmem:[%s2462_s27 + $0x188] sm:$0xff] %v1539_v22 }
 0x14e   : >> { %1542 = vst [vmem:[%s2462_s27 + $0x190] sm:$0xff] %v1541_v23  ;;  %1544 = vst [vmem:[%s2462_s27 + $0x198] sm:$0xff] %v1543_v24 }
 0x14f   : >> { %1546 = vst [vmem:[%s2462_s27 + $0x1a0] sm:$0xff] %v1545_v6  ;;  %1548 = vst [vmem:[%s2462_s27 + $0x1a8] sm:$0xff] %v1547_v7 }
 0x150   : >> { %1550 = vst [vmem:[%s2462_s27 + $0x1b0] sm:$0xff] %v1549_v9  ;;  %1552 = vst [vmem:[%s2462_s27 + $0x1b8] sm:$0xff] %v1551_v25  ;;  %s3543_s27 = smov %s1559_s20 }
 0x151 PF: > { %s3546_s16 = sld [smem:[#allocation16_spill]]  ;;  %2279 = sdivrem.u32 %s1395_s23, 24 }
 0x152   : > { %s2047_s13 = smul.u32 3072, %s3262_s8 }
 0x154   : > { %s1564_s4 = sshra.s32 %s2047_s13, 4 }
 0x155   : > { %s3412_s15 = scalar_lea.vmem %s3070_s19, %s1564_s4  }
 0x157   : > { %s3409_s1 = scalar_lea.vmem %s3546_s16, %s1564_s4  }
 0x15a   : > { %s3414_s11 = spop.drf %2279 }
 0x15b   : > { %p2049_p8 = scmp.le.s32.totalorder %s3414_s11, 0 }
 0x15c   : > { %s3547_s12 = smov (!%p2049_p8), %s3412_s15  ;;  %s2480_s22 = smov (!%p2049_p8), %s3409_s1  }
 0x15d   : > { %1824 = sbr.rel (%p2049_p8) target bundleno = 362 (0x16a), region = 244  ;;  %s2484_s14 = smov (!%p2049_p8), 0  }
 0x15e   : > { %s2488_s9 = smov (!%p2049_p8), 0  }
 0x162 LB: >> { %v1580_v27 = vld [vmem:[%s2482_s22] sm:$0xff]  ;;  %v1582_v28 = vld [vmem:[%s2482_s22 + $0x38] sm:$0xff]  ;;  %v1584_v29 = vld [vmem:[%s2482_s22 + $0x70] sm:$0xff]  ;;  %s1586_s23 = sadd.s32 1, %s2486_s14  ;;  %s1574_s9 = sadd.s32 1, %s2490_s9   ;;  %s2490_s9 = sphi %s2488_s9, %s1574_s9   ;;  %s2486_s14 = sphi %s2484_s14, %s2485_s14   ;;  %s2482_s22 = sphi %s2480_s22, %s1591_s22   ;;  %s2478_s12 = sphi %s3547_s12, %s1592_s12  }
 0x163   : >> { %1581 = vst [vmem:[%s2478_s12] sm:$0xff] %v1580_v27  ;;  %1583 = vst [vmem:[%s2478_s12 + $0x80] sm:$0xff] %v1582_v28  ;;  %p1587_p11 = scmp.ge.s32.totalorder %s1586_s23, %s3414_s11  ;;  %p1573_p5 = scmp.ge.s32.totalorder %s1574_s9, %s3414_s11 }
 0x164   : >> { %1585 = vst [vmem:[%s2478_s12 + $0x100] sm:$0xff] %v1584_v29 }
 0x165   : >> { %s3571_s23 = smov (%p1587_p11, %s1586_s23), 0  ;;  %1576 = sbr.rel (!%p1573_p5) target bundleno = 354 (0x162), region = 250 }
 0x166   : >> { %s2050_s8 = sshll.u32 %s3571_s23, 3  ;;  %s2485_s14 = smov %s3571_s23  }
 0x167   : >> { %s1591_s22 = scalar_lea.vmem %s3409_s1, %s2050_s8   ;;  %s1592_s12 = scalar_lea.vmem %s3412_s15, %s2050_s8  }
 0x16a PF: > { %s2493_s2 = smov 1  }
 0x16b   : > { %s1593_s27 = sshll.u32 %s2493_s2, %s3076_s24 }
 0x16c   : > { %s2052_s21 = sadd.s32 4294967295, %s1593_s27 }
 0x16d   : > { %v1603_v30 = vld [vmem:[%s3255_s18] sm:%s2052_s21]  ;;  %v1605_v32 = vld [vmem:[%s3255_s18 + $0x38] sm:%s2052_s21] }
 0x16e   : > { %1604 = vst [vmem:[%s3258_s10] sm:%s2052_s21] %v1603_v30  ;;  %1606 = vst [vmem:[%s3258_s10 + $0x80] sm:%s2052_s21] %v1605_v32 }
 0x16f   : > { %v1607_v33 = vld [vmem:[%s3255_s18 + $0x70] sm:%s2052_s21] }
 0x170   : > { %1608 = vst [vmem:[%s3258_s10 + $0x100] sm:%s2052_s21] %v1607_v33 }
 0x171 PF: > { %p2053_p12 = scmp.ge.u32.totalorder %s3072_s0, 8 }
 0x172   : > { %s2494_s28 = smov (!%p2053_p12), 1   ;;  %s3548_s26 = sld [smem:[#allocation16_spill]] (!%p2053_p12) }
 0x173   : > { %1167 = sbr.rel (%p2053_p12) target bundleno = 380 (0x17c), region = 79  ;;  %s1168_s24 = sshll.u32 (!%p2053_p12), %s2494_s28, %s3072_s0 }
 0x174   : > { %s2054_s29 = sadd.s32 (!%p2053_p12), 4294967295, %s1168_s24 }
 0x178   : > { %v1178_v34 = vld [vmem:[%s3548_s26] sm:%s2054_s29]  ;;  %v1180_v35 = vld [vmem:[%s3548_s26 + $0x38] sm:%s2054_s29] }
 0x179   : > { %1179 = vst [vmem:[%s3070_s19] sm:%s2054_s29] %v1178_v34  ;;  %1181 = vst [vmem:[%s3070_s19 + $0x80] sm:%s2054_s29] %v1180_v35 }
 0x17a   : > { %v1182_v36 = vld [vmem:[%s3548_s26 + $0x70] sm:%s2054_s29] }
 0x17b   : > { %1183 = vst [vmem:[%s3070_s19 + $0x100] sm:%s2054_s29] %v1182_v36 }
 0x17c PF: > { %s3549_s18 = sld [smem:[#allocation10_spill]] }
 0x17d   : > { %s3550_s27 = sld [smem:[#allocation6_spill]] }
 0x17e   : > { %s3551_s28 = sld [smem:[#allocation14_spill]] }
 0x17f   : > { %s3552_s29 = sld [smem:[#allocation8_spill]] }
 0x180   : > { %s3553_s30 = sld [smem:[#allocation9_spill]] }
 0x181   : > { %s3554_s9 = sld [smem:[#allocation11_spill]] }
 0x182   : > { %s19_s11 = sadd.s32 1, %s3549_s18   ;;  %s3555_s10 = sld [smem:[#allocation13_spill]] }
 0x183   : > { %p16_p13 = scmp.ge.s32.totalorder %s19_s11, 6  }
 0x185   :  { %18 = sbr.rel (!%p16_p13) target bundleno = 10 (0xa), region = 261 }
 0x18a   :  { %1622 = vsyncpa [#allocation3], 1 }
 0x18b   :  { %1624 = vsyncpa [#allocation3 + $0x1], 1 }

</bundles_post_ra>
